<compile_context>
chip_gen: v5e
topology: v5e:2x2
jax: 0.10.0
libtpu: 0.0.40
codegen_flags: <defaults>
</compile_context>

<pallas_src>
import jax
import jax.numpy as jnp
from jax.experimental import pallas as pl
from jax.experimental.pallas import tpu as pltpu


def simple_fcnn_kernel(x_ref, w1_ref, b1_ref, wh_ref, bh_ref, wo_ref, bo_ref, o_ref):
    """One folded batch tile of the whole MLP.

    x_ref : (TB, F*IN)        f32  folded input tile (F batch rows per lane row)
    w1_ref: (F*IN, F*H)       bf16 block-diagonal first-layer weight
    b1_ref: (1, F*H)          f32  tiled first-layer bias
    wh_ref: (L, F*H, F*H)     bf16 stacked block-diagonal hidden weights
    bh_ref: (L, F*H)          f32  stacked tiled hidden biases
    wo_ref: (F*H, F*OUT)      bf16 block-diagonal last-layer weight
    bo_ref: (1, F*OUT)        f32  tiled last-layer bias
    o_ref : (TB, F*OUT)       f32  folded output tile
    """
    # first_layer + ReLU  (bf16 matmul, f32 accumulate, f32 elementwise)
    h = jnp.dot(x_ref[...].astype(jnp.bfloat16), w1_ref[...],
                preferred_element_type=jnp.float32)
    h = jnp.maximum(h + b1_ref[...], 0.0)

    # hidden layers: Linear(H, H) + ReLU, statically unrolled (L is trace-time const)
    num_hidden = wh_ref.shape[0]
    for i in range(num_hidden):
        y = jnp.dot(h.astype(jnp.bfloat16), wh_ref[i],
                    preferred_element_type=jnp.float32)
        h = jnp.maximum(y + bh_ref[pl.ds(i, 1), :], 0.0)

    # last_layer (no activation); lane-sparse (24-wide) store is intentionally kept.
    out = jnp.dot(h.astype(jnp.bfloat16), wo_ref[...],
                  preferred_element_type=jnp.float32) + bo_ref[...]
    o_ref[...] = out.astype(o_ref.dtype)


def _round_up(x, m):
    return ((x + m - 1) // m) * m


def fold_params(params, fold):
    """Build block-diagonal (lane-folded) weights: kron(I_fold, W), tiled biases."""
    w1, b1, wh, bh, wo, bo = params
    eye = jnp.eye(fold, dtype=jnp.float32)
    w1_f = jnp.kron(eye, w1)                                            # (F*in, F*H)
    wh_f = jnp.stack([jnp.kron(eye, wh[i]) for i in range(wh.shape[0])], axis=0)
    wo_f = jnp.kron(eye, wo)                                            # (F*H, F*out)
    b1_f = jnp.tile(b1, (1, fold))                                      # (1, F*H)
    bh_f = jnp.tile(bh, (1, fold))                                      # (L, F*H)
    bo_f = jnp.tile(bo, (1, fold))                                      # (1, F*out)
    return w1_f, b1_f, wh_f, bh_f, wo_f, bo_f


def simple_fcnn_forward(x, params, *, tb=512, fold=4):
    """Gridded forward pass over the folded batch; weights stay VMEM-resident.

    tb = folded rows per grid step (fold*tb original batch rows)."""
    w1, b1, wh, bh, wo, bo = params
    B, in_size = x.shape
    H = w1.shape[1]
    L = wh.shape[0]
    out_size = wo.shape[1]
    IN_F, H_F, OUT_F = fold * in_size, fold * H, fold * out_size

    # Fold weights once (block-diag), cast matmul operands to bf16 (MXU-native).
    w1_f, b1_f, wh_f, bh_f, wo_f, bo_f = fold_params(params, fold)
    w1_b = w1_f.astype(jnp.bfloat16)
    wh_b = wh_f.astype(jnp.bfloat16)
    wo_b = wo_f.astype(jnp.bfloat16)

    # Folded batch rows, padded; tile choice keeps the parallel grid >= 2 steps
    # for small batches (v7x megacore) and uses the big tile for large batches.
    bf = pl.cdiv(B, fold)
    bf8 = _round_up(bf, 8)
    if bf8 <= tb:
        n_steps = 2 if bf8 >= 16 else 1
        tb_eff = _round_up(pl.cdiv(bf8, n_steps), 8)
    else:
        tb_eff = tb
    bf_pad = _round_up(bf8, tb_eff)
    b_pad = bf_pad * fold
    if b_pad != B:
        x = jnp.pad(x, ((0, b_pad - B), (0, 0)))
    x_fold = x.reshape(bf_pad, IN_F)
    grid = (bf_pad // tb_eff,)

    out_fold = pl.pallas_call(
        simple_fcnn_kernel,
        out_shape=jax.ShapeDtypeStruct((bf_pad, OUT_F), jnp.float32),
        grid=grid,
        in_specs=[
            pl.BlockSpec((tb_eff, IN_F), lambda i: (i, 0)),      # folded x tile
            pl.BlockSpec((IN_F, H_F), lambda i: (0, 0)),         # w1 (resident)
            pl.BlockSpec((1, H_F), lambda i: (0, 0)),            # b1 (resident)
            pl.BlockSpec((L, H_F, H_F), lambda i: (0, 0, 0)),    # wh (resident)
            pl.BlockSpec((L, H_F), lambda i: (0, 0)),            # bh (resident)
            pl.BlockSpec((H_F, OUT_F), lambda i: (0, 0)),        # wo (resident)
            pl.BlockSpec((1, OUT_F), lambda i: (0, 0)),          # bo (resident)
        ],
        out_specs=pl.BlockSpec((tb_eff, OUT_F), lambda i: (i, 0)),
        compiler_params=pltpu.CompilerParams(
            dimension_semantics=("parallel",)),                  # shard batch over TCs
    )(x_fold, w1_b, b1_f, wh_b, bh_f, wo_b, bo_f)

    # Unfold lanes back to (batch, out_size).
    return out_fold.reshape(b_pad, out_size)[:B]


def init_params(key, input_size, hidden_size, output_size, num_layers):
    """Deterministic init mimicking PyTorch nn.Linear default:
    U(-1/sqrt(fan_in), 1/sqrt(fan_in)). Weights stored transposed (in, out)."""
    L = num_layers - 2
    keys = jax.random.split(key, 2 * (L + 2))

    def linear(kw, kb, fan_in, fan_out):
        bound = 1.0 / jnp.sqrt(jnp.float32(fan_in))
        w = jax.random.uniform(kw, (fan_in, fan_out), jnp.float32, -bound, bound)
        b = jax.random.uniform(kb, (fan_out,), jnp.float32, -bound, bound)
        return w, b

    w1, b1 = linear(keys[0], keys[1], input_size, hidden_size)

    wh_list, bh_list = [], []
    for i in range(L):
        w, b = linear(keys[2 + 2 * i], keys[3 + 2 * i], hidden_size, hidden_size)
        wh_list.append(w)
        bh_list.append(b)
    wh = jnp.stack(wh_list, axis=0)          # (L, H, H)
    bh = jnp.stack(bh_list, axis=0)          # (L, H)

    wo, bo = linear(keys[2 + 2 * L], keys[3 + 2 * L], hidden_size, output_size)
    return (w1, b1[None, :], wh, bh, wo, bo[None, :])


def reference_forward(x, params):
    """Plain-JAX reference with the same precision policy as the kernel
    (bf16 matmul inputs, f32 accumulation, f32 elementwise). Lane folding is
    mathematically exact (off-diagonal blocks are zero), so this unfolded
    reference is the correctness oracle."""
    w1, b1, wh, bh, wo, bo = params
    bf = jnp.bfloat16
    h = jnp.dot(x.astype(bf), w1.astype(bf), preferred_element_type=jnp.float32)
    h = jnp.maximum(h + b1, 0.0)
    for i in range(wh.shape[0]):
        y = jnp.dot(h.astype(bf), wh[i].astype(bf), preferred_element_type=jnp.float32)
        h = jnp.maximum(y + bh[i][None, :], 0.0)
    return jnp.dot(h.astype(bf), wo.astype(bf), preferred_element_type=jnp.float32) + bo


if __name__ == "__main__":
    # Shapes implied by the file name discrete_flow_6_16_32 and module globals:
    # input_size=6, num_layers=16, hidden_size=32; output_size = input_size.
    input_size = 6
    hidden_size = 32
    output_size = 6
    num_layers = 16
    batch = 512        # small demo batch -> 128 folded rows -> 2 grid steps of 64

    key = jax.random.PRNGKey(0)
    k_x, k_p = jax.random.split(key)
    x = jax.random.normal(k_x, (batch, input_size), dtype=jnp.float32)
    params = init_params(k_p, input_size, hidden_size, output_size, num_layers)

    out = simple_fcnn_forward(x, params)
    out = jax.block_until_ready(out)

    ref = reference_forward(x, params)
    assert out.shape == (batch, output_size)
    assert jnp.allclose(out, ref, atol=2e-3, rtol=2e-3), "Pallas kernel mismatch vs reference"

    print("KERNEL_OK")
</pallas_src>

<mosaic_0001>
module attributes {stable_mosaic.version = 11 : i64} {
  func.func @simple_fcnn_kernel(%arg0: i32, %arg1: memref<64x24xf32, #tpu.memory_space<vmem>>, %arg2: memref<24x128xbf16, #tpu.memory_space<vmem>>, %arg3: memref<1x128xf32, #tpu.memory_space<vmem>>, %arg4: memref<14x128x128xbf16, #tpu.memory_space<vmem>>, %arg5: memref<14x128xf32, #tpu.memory_space<vmem>>, %arg6: memref<128x24xbf16, #tpu.memory_space<vmem>>, %arg7: memref<1x24xf32, #tpu.memory_space<vmem>>, %arg8: memref<64x24xf32, #tpu.memory_space<vmem>>) attributes {dimension_semantics = [#tpu.dimension_semantics<parallel>], iteration_bounds = array<i64: 2>, scalar_prefetch = 0 : i64, scratch_operands = 0 : i64, tpu.core_type = #tpu.core_type<tc>, window_params = [{transform_indices = @transform_0, window_bounds = array<i64: 64, 24>}, {pipeline_mode = #tpu.pipeline_mode<synchronous>, transform_indices = @transform_1, window_bounds = array<i64: 24, 128>}, {pipeline_mode = #tpu.pipeline_mode<synchronous>, transform_indices = @transform_2, window_bounds = array<i64: 1, 128>}, {pipeline_mode = #tpu.pipeline_mode<synchronous>, transform_indices = @transform_3, window_bounds = array<i64: 14, 128, 128>}, {pipeline_mode = #tpu.pipeline_mode<synchronous>, transform_indices = @transform_4, window_bounds = array<i64: 14, 128>}, {pipeline_mode = #tpu.pipeline_mode<synchronous>, transform_indices = @transform_5, window_bounds = array<i64: 128, 24>}, {pipeline_mode = #tpu.pipeline_mode<synchronous>, transform_indices = @transform_6, window_bounds = array<i64: 1, 24>}, {transform_indices = @transform_7, window_bounds = array<i64: 64, 24>}]} {
    %c0 = arith.constant 0 : index
    %c0_0 = arith.constant 0 : index
    %0 = vector.load %arg1[%c0, %c0_0] : memref<64x24xf32, #tpu.memory_space<vmem>>, vector<64x24xf32>
    %1 = arith.truncf %0 : vector<64x24xf32> to vector<64x24xbf16>
    %c0_1 = arith.constant 0 : index
    %c0_2 = arith.constant 0 : index
    %2 = vector.load %arg2[%c0_1, %c0_2] : memref<24x128xbf16, #tpu.memory_space<vmem>>, vector<24x128xbf16>
    %cst = arith.constant dense<0.000000e+00> : vector<64x128xf32>
    %3 = tpu.matmul %1, %2, %cst {dimension_numbers = #tpu.dot_dimension_numbers<[1], [0], [0], [1], [0, 0, 1, 1], [], []>} : vector<64x24xbf16>, vector<24x128xbf16>, vector<64x128xf32> -> vector<64x128xf32>
    %c0_3 = arith.constant 0 : index
    %c0_4 = arith.constant 0 : index
    %4 = vector.load %arg3[%c0_3, %c0_4] : memref<1x128xf32, #tpu.memory_space<vmem>>, vector<1x128xf32>
    %5 = vector.broadcast %4 : vector<1x128xf32> to vector<64x128xf32>
    %6 = arith.addf %3, %5 : vector<64x128xf32>
    %cst_5 = arith.constant 0.000000e+00 : f32
    %7 = vector.broadcast %cst_5 : f32 to vector<64x128xf32>
    %8 = arith.maximumf %6, %7 : vector<64x128xf32>
    %9 = arith.truncf %8 : vector<64x128xf32> to vector<64x128xbf16>
    %c0_6 = arith.constant 0 : index
    %c0_7 = arith.constant 0 : index
    %c0_8 = arith.constant 0 : index
    %10 = vector.load %arg4[%c0_6, %c0_7, %c0_8] : memref<14x128x128xbf16, #tpu.memory_space<vmem>>, vector<1x128x128xbf16>
    %11 = vector.shape_cast %10 : vector<1x128x128xbf16> to vector<128x128xbf16>
    %cst_9 = arith.constant dense<0.000000e+00> : vector<64x128xf32>
    %12 = tpu.matmul %9, %11, %cst_9 {dimension_numbers = #tpu.dot_dimension_numbers<[1], [0], [0], [1], [0, 0, 1, 1], [], []>} : vector<64x128xbf16>, vector<128x128xbf16>, vector<64x128xf32> -> vector<64x128xf32>
    %c0_10 = arith.constant 0 : index
    %c0_11 = arith.constant 0 : index
    %13 = vector.load %arg5[%c0_10, %c0_11] : memref<14x128xf32, #tpu.memory_space<vmem>>, vector<1x128xf32>
    %14 = vector.broadcast %13 : vector<1x128xf32> to vector<64x128xf32>
    %15 = arith.addf %12, %14 : vector<64x128xf32>
    %cst_12 = arith.constant 0.000000e+00 : f32
    %16 = vector.broadcast %cst_12 : f32 to vector<64x128xf32>
    %17 = arith.maximumf %15, %16 : vector<64x128xf32>
    %18 = arith.truncf %17 : vector<64x128xf32> to vector<64x128xbf16>
    %c1 = arith.constant 1 : index
    %c0_13 = arith.constant 0 : index
    %c0_14 = arith.constant 0 : index
    %19 = vector.load %arg4[%c1, %c0_13, %c0_14] : memref<14x128x128xbf16, #tpu.memory_space<vmem>>, vector<1x128x128xbf16>
    %20 = vector.shape_cast %19 : vector<1x128x128xbf16> to vector<128x128xbf16>
    %cst_15 = arith.constant dense<0.000000e+00> : vector<64x128xf32>
    %21 = tpu.matmul %18, %20, %cst_15 {dimension_numbers = #tpu.dot_dimension_numbers<[1], [0], [0], [1], [0, 0, 1, 1], [], []>} : vector<64x128xbf16>, vector<128x128xbf16>, vector<64x128xf32> -> vector<64x128xf32>
    %c1_16 = arith.constant 1 : index
    %c0_17 = arith.constant 0 : index
    %22 = vector.load %arg5[%c1_16, %c0_17] : memref<14x128xf32, #tpu.memory_space<vmem>>, vector<1x128xf32>
    %23 = vector.broadcast %22 : vector<1x128xf32> to vector<64x128xf32>
    %24 = arith.addf %21, %23 : vector<64x128xf32>
    %cst_18 = arith.constant 0.000000e+00 : f32
    %25 = vector.broadcast %cst_18 : f32 to vector<64x128xf32>
    %26 = arith.maximumf %24, %25 : vector<64x128xf32>
    %27 = arith.truncf %26 : vector<64x128xf32> to vector<64x128xbf16>
    %c2 = arith.constant 2 : index
    %c0_19 = arith.constant 0 : index
    %c0_20 = arith.constant 0 : index
    %28 = vector.load %arg4[%c2, %c0_19, %c0_20] : memref<14x128x128xbf16, #tpu.memory_space<vmem>>, vector<1x128x128xbf16>
    %29 = vector.shape_cast %28 : vector<1x128x128xbf16> to vector<128x128xbf16>
    %cst_21 = arith.constant dense<0.000000e+00> : vector<64x128xf32>
    %30 = tpu.matmul %27, %29, %cst_21 {dimension_numbers = #tpu.dot_dimension_numbers<[1], [0], [0], [1], [0, 0, 1, 1], [], []>} : vector<64x128xbf16>, vector<128x128xbf16>, vector<64x128xf32> -> vector<64x128xf32>
    %c2_22 = arith.constant 2 : index
    %c0_23 = arith.constant 0 : index
    %31 = vector.load %arg5[%c2_22, %c0_23] : memref<14x128xf32, #tpu.memory_space<vmem>>, vector<1x128xf32>
    %32 = vector.broadcast %31 : vector<1x128xf32> to vector<64x128xf32>
    %33 = arith.addf %30, %32 : vector<64x128xf32>
    %cst_24 = arith.constant 0.000000e+00 : f32
    %34 = vector.broadcast %cst_24 : f32 to vector<64x128xf32>
    %35 = arith.maximumf %33, %34 : vector<64x128xf32>
    %36 = arith.truncf %35 : vector<64x128xf32> to vector<64x128xbf16>
    %c3 = arith.constant 3 : index
    %c0_25 = arith.constant 0 : index
    %c0_26 = arith.constant 0 : index
    %37 = vector.load %arg4[%c3, %c0_25, %c0_26] : memref<14x128x128xbf16, #tpu.memory_space<vmem>>, vector<1x128x128xbf16>
    %38 = vector.shape_cast %37 : vector<1x128x128xbf16> to vector<128x128xbf16>
    %cst_27 = arith.constant dense<0.000000e+00> : vector<64x128xf32>
    %39 = tpu.matmul %36, %38, %cst_27 {dimension_numbers = #tpu.dot_dimension_numbers<[1], [0], [0], [1], [0, 0, 1, 1], [], []>} : vector<64x128xbf16>, vector<128x128xbf16>, vector<64x128xf32> -> vector<64x128xf32>
    %c3_28 = arith.constant 3 : index
    %c0_29 = arith.constant 0 : index
    %40 = vector.load %arg5[%c3_28, %c0_29] : memref<14x128xf32, #tpu.memory_space<vmem>>, vector<1x128xf32>
    %41 = vector.broadcast %40 : vector<1x128xf32> to vector<64x128xf32>
    %42 = arith.addf %39, %41 : vector<64x128xf32>
    %cst_30 = arith.constant 0.000000e+00 : f32
    %43 = vector.broadcast %cst_30 : f32 to vector<64x128xf32>
    %44 = arith.maximumf %42, %43 : vector<64x128xf32>
    %45 = arith.truncf %44 : vector<64x128xf32> to vector<64x128xbf16>
    %c4 = arith.constant 4 : index
    %c0_31 = arith.constant 0 : index
    %c0_32 = arith.constant 0 : index
    %46 = vector.load %arg4[%c4, %c0_31, %c0_32] : memref<14x128x128xbf16, #tpu.memory_space<vmem>>, vector<1x128x128xbf16>
    %47 = vector.shape_cast %46 : vector<1x128x128xbf16> to vector<128x128xbf16>
    %cst_33 = arith.constant dense<0.000000e+00> : vector<64x128xf32>
    %48 = tpu.matmul %45, %47, %cst_33 {dimension_numbers = #tpu.dot_dimension_numbers<[1], [0], [0], [1], [0, 0, 1, 1], [], []>} : vector<64x128xbf16>, vector<128x128xbf16>, vector<64x128xf32> -> vector<64x128xf32>
    %c4_34 = arith.constant 4 : index
    %c0_35 = arith.constant 0 : index
    %49 = vector.load %arg5[%c4_34, %c0_35] : memref<14x128xf32, #tpu.memory_space<vmem>>, vector<1x128xf32>
    %50 = vector.broadcast %49 : vector<1x128xf32> to vector<64x128xf32>
    %51 = arith.addf %48, %50 : vector<64x128xf32>
    %cst_36 = arith.constant 0.000000e+00 : f32
    %52 = vector.broadcast %cst_36 : f32 to vector<64x128xf32>
    %53 = arith.maximumf %51, %52 : vector<64x128xf32>
    %54 = arith.truncf %53 : vector<64x128xf32> to vector<64x128xbf16>
    %c5 = arith.constant 5 : index
    %c0_37 = arith.constant 0 : index
    %c0_38 = arith.constant 0 : index
    %55 = vector.load %arg4[%c5, %c0_37, %c0_38] : memref<14x128x128xbf16, #tpu.memory_space<vmem>>, vector<1x128x128xbf16>
    %56 = vector.shape_cast %55 : vector<1x128x128xbf16> to vector<128x128xbf16>
    %cst_39 = arith.constant dense<0.000000e+00> : vector<64x128xf32>
    %57 = tpu.matmul %54, %56, %cst_39 {dimension_numbers = #tpu.dot_dimension_numbers<[1], [0], [0], [1], [0, 0, 1, 1], [], []>} : vector<64x128xbf16>, vector<128x128xbf16>, vector<64x128xf32> -> vector<64x128xf32>
    %c5_40 = arith.constant 5 : index
    %c0_41 = arith.constant 0 : index
    %58 = vector.load %arg5[%c5_40, %c0_41] : memref<14x128xf32, #tpu.memory_space<vmem>>, vector<1x128xf32>
    %59 = vector.broadcast %58 : vector<1x128xf32> to vector<64x128xf32>
    %60 = arith.addf %57, %59 : vector<64x128xf32>
    %cst_42 = arith.constant 0.000000e+00 : f32
    %61 = vector.broadcast %cst_42 : f32 to vector<64x128xf32>
    %62 = arith.maximumf %60, %61 : vector<64x128xf32>
    %63 = arith.truncf %62 : vector<64x128xf32> to vector<64x128xbf16>
    %c6 = arith.constant 6 : index
    %c0_43 = arith.constant 0 : index
    %c0_44 = arith.constant 0 : index
    %64 = vector.load %arg4[%c6, %c0_43, %c0_44] : memref<14x128x128xbf16, #tpu.memory_space<vmem>>, vector<1x128x128xbf16>
    %65 = vector.shape_cast %64 : vector<1x128x128xbf16> to vector<128x128xbf16>
    %cst_45 = arith.constant dense<0.000000e+00> : vector<64x128xf32>
    %66 = tpu.matmul %63, %65, %cst_45 {dimension_numbers = #tpu.dot_dimension_numbers<[1], [0], [0], [1], [0, 0, 1, 1], [], []>} : vector<64x128xbf16>, vector<128x128xbf16>, vector<64x128xf32> -> vector<64x128xf32>
    %c6_46 = arith.constant 6 : index
    %c0_47 = arith.constant 0 : index
    %67 = vector.load %arg5[%c6_46, %c0_47] : memref<14x128xf32, #tpu.memory_space<vmem>>, vector<1x128xf32>
    %68 = vector.broadcast %67 : vector<1x128xf32> to vector<64x128xf32>
    %69 = arith.addf %66, %68 : vector<64x128xf32>
    %cst_48 = arith.constant 0.000000e+00 : f32
    %70 = vector.broadcast %cst_48 : f32 to vector<64x128xf32>
    %71 = arith.maximumf %69, %70 : vector<64x128xf32>
    %72 = arith.truncf %71 : vector<64x128xf32> to vector<64x128xbf16>
    %c7 = arith.constant 7 : index
    %c0_49 = arith.constant 0 : index
    %c0_50 = arith.constant 0 : index
    %73 = vector.load %arg4[%c7, %c0_49, %c0_50] : memref<14x128x128xbf16, #tpu.memory_space<vmem>>, vector<1x128x128xbf16>
    %74 = vector.shape_cast %73 : vector<1x128x128xbf16> to vector<128x128xbf16>
    %cst_51 = arith.constant dense<0.000000e+00> : vector<64x128xf32>
    %75 = tpu.matmul %72, %74, %cst_51 {dimension_numbers = #tpu.dot_dimension_numbers<[1], [0], [0], [1], [0, 0, 1, 1], [], []>} : vector<64x128xbf16>, vector<128x128xbf16>, vector<64x128xf32> -> vector<64x128xf32>
    %c7_52 = arith.constant 7 : index
    %c0_53 = arith.constant 0 : index
    %76 = vector.load %arg5[%c7_52, %c0_53] : memref<14x128xf32, #tpu.memory_space<vmem>>, vector<1x128xf32>
    %77 = vector.broadcast %76 : vector<1x128xf32> to vector<64x128xf32>
    %78 = arith.addf %75, %77 : vector<64x128xf32>
    %cst_54 = arith.constant 0.000000e+00 : f32
    %79 = vector.broadcast %cst_54 : f32 to vector<64x128xf32>
    %80 = arith.maximumf %78, %79 : vector<64x128xf32>
    %81 = arith.truncf %80 : vector<64x128xf32> to vector<64x128xbf16>
    %c8 = arith.constant 8 : index
    %c0_55 = arith.constant 0 : index
    %c0_56 = arith.constant 0 : index
    %82 = vector.load %arg4[%c8, %c0_55, %c0_56] : memref<14x128x128xbf16, #tpu.memory_space<vmem>>, vector<1x128x128xbf16>
    %83 = vector.shape_cast %82 : vector<1x128x128xbf16> to vector<128x128xbf16>
    %cst_57 = arith.constant dense<0.000000e+00> : vector<64x128xf32>
    %84 = tpu.matmul %81, %83, %cst_57 {dimension_numbers = #tpu.dot_dimension_numbers<[1], [0], [0], [1], [0, 0, 1, 1], [], []>} : vector<64x128xbf16>, vector<128x128xbf16>, vector<64x128xf32> -> vector<64x128xf32>
    %c8_58 = arith.constant 8 : index
    %c0_59 = arith.constant 0 : index
    %85 = vector.load %arg5[%c8_58, %c0_59] : memref<14x128xf32, #tpu.memory_space<vmem>>, vector<1x128xf32>
    %86 = vector.broadcast %85 : vector<1x128xf32> to vector<64x128xf32>
    %87 = arith.addf %84, %86 : vector<64x128xf32>
    %cst_60 = arith.constant 0.000000e+00 : f32
    %88 = vector.broadcast %cst_60 : f32 to vector<64x128xf32>
    %89 = arith.maximumf %87, %88 : vector<64x128xf32>
    %90 = arith.truncf %89 : vector<64x128xf32> to vector<64x128xbf16>
    %c9 = arith.constant 9 : index
    %c0_61 = arith.constant 0 : index
    %c0_62 = arith.constant 0 : index
    %91 = vector.load %arg4[%c9, %c0_61, %c0_62] : memref<14x128x128xbf16, #tpu.memory_space<vmem>>, vector<1x128x128xbf16>
    %92 = vector.shape_cast %91 : vector<1x128x128xbf16> to vector<128x128xbf16>
    %cst_63 = arith.constant dense<0.000000e+00> : vector<64x128xf32>
    %93 = tpu.matmul %90, %92, %cst_63 {dimension_numbers = #tpu.dot_dimension_numbers<[1], [0], [0], [1], [0, 0, 1, 1], [], []>} : vector<64x128xbf16>, vector<128x128xbf16>, vector<64x128xf32> -> vector<64x128xf32>
    %c9_64 = arith.constant 9 : index
    %c0_65 = arith.constant 0 : index
    %94 = vector.load %arg5[%c9_64, %c0_65] : memref<14x128xf32, #tpu.memory_space<vmem>>, vector<1x128xf32>
    %95 = vector.broadcast %94 : vector<1x128xf32> to vector<64x128xf32>
    %96 = arith.addf %93, %95 : vector<64x128xf32>
    %cst_66 = arith.constant 0.000000e+00 : f32
    %97 = vector.broadcast %cst_66 : f32 to vector<64x128xf32>
    %98 = arith.maximumf %96, %97 : vector<64x128xf32>
    %99 = arith.truncf %98 : vector<64x128xf32> to vector<64x128xbf16>
    %c10 = arith.constant 10 : index
    %c0_67 = arith.constant 0 : index
    %c0_68 = arith.constant 0 : index
    %100 = vector.load %arg4[%c10, %c0_67, %c0_68] : memref<14x128x128xbf16, #tpu.memory_space<vmem>>, vector<1x128x128xbf16>
    %101 = vector.shape_cast %100 : vector<1x128x128xbf16> to vector<128x128xbf16>
    %cst_69 = arith.constant dense<0.000000e+00> : vector<64x128xf32>
    %102 = tpu.matmul %99, %101, %cst_69 {dimension_numbers = #tpu.dot_dimension_numbers<[1], [0], [0], [1], [0, 0, 1, 1], [], []>} : vector<64x128xbf16>, vector<128x128xbf16>, vector<64x128xf32> -> vector<64x128xf32>
    %c10_70 = arith.constant 10 : index
    %c0_71 = arith.constant 0 : index
    %103 = vector.load %arg5[%c10_70, %c0_71] : memref<14x128xf32, #tpu.memory_space<vmem>>, vector<1x128xf32>
    %104 = vector.broadcast %103 : vector<1x128xf32> to vector<64x128xf32>
    %105 = arith.addf %102, %104 : vector<64x128xf32>
    %cst_72 = arith.constant 0.000000e+00 : f32
    %106 = vector.broadcast %cst_72 : f32 to vector<64x128xf32>
    %107 = arith.maximumf %105, %106 : vector<64x128xf32>
    %108 = arith.truncf %107 : vector<64x128xf32> to vector<64x128xbf16>
    %c11 = arith.constant 11 : index
    %c0_73 = arith.constant 0 : index
    %c0_74 = arith.constant 0 : index
    %109 = vector.load %arg4[%c11, %c0_73, %c0_74] : memref<14x128x128xbf16, #tpu.memory_space<vmem>>, vector<1x128x128xbf16>
    %110 = vector.shape_cast %109 : vector<1x128x128xbf16> to vector<128x128xbf16>
    %cst_75 = arith.constant dense<0.000000e+00> : vector<64x128xf32>
    %111 = tpu.matmul %108, %110, %cst_75 {dimension_numbers = #tpu.dot_dimension_numbers<[1], [0], [0], [1], [0, 0, 1, 1], [], []>} : vector<64x128xbf16>, vector<128x128xbf16>, vector<64x128xf32> -> vector<64x128xf32>
    %c11_76 = arith.constant 11 : index
    %c0_77 = arith.constant 0 : index
    %112 = vector.load %arg5[%c11_76, %c0_77] : memref<14x128xf32, #tpu.memory_space<vmem>>, vector<1x128xf32>
    %113 = vector.broadcast %112 : vector<1x128xf32> to vector<64x128xf32>
    %114 = arith.addf %111, %113 : vector<64x128xf32>
    %cst_78 = arith.constant 0.000000e+00 : f32
    %115 = vector.broadcast %cst_78 : f32 to vector<64x128xf32>
    %116 = arith.maximumf %114, %115 : vector<64x128xf32>
    %117 = arith.truncf %116 : vector<64x128xf32> to vector<64x128xbf16>
    %c12 = arith.constant 12 : index
    %c0_79 = arith.constant 0 : index
    %c0_80 = arith.constant 0 : index
    %118 = vector.load %arg4[%c12, %c0_79, %c0_80] : memref<14x128x128xbf16, #tpu.memory_space<vmem>>, vector<1x128x128xbf16>
    %119 = vector.shape_cast %118 : vector<1x128x128xbf16> to vector<128x128xbf16>
    %cst_81 = arith.constant dense<0.000000e+00> : vector<64x128xf32>
    %120 = tpu.matmul %117, %119, %cst_81 {dimension_numbers = #tpu.dot_dimension_numbers<[1], [0], [0], [1], [0, 0, 1, 1], [], []>} : vector<64x128xbf16>, vector<128x128xbf16>, vector<64x128xf32> -> vector<64x128xf32>
    %c12_82 = arith.constant 12 : index
    %c0_83 = arith.constant 0 : index
    %121 = vector.load %arg5[%c12_82, %c0_83] : memref<14x128xf32, #tpu.memory_space<vmem>>, vector<1x128xf32>
    %122 = vector.broadcast %121 : vector<1x128xf32> to vector<64x128xf32>
    %123 = arith.addf %120, %122 : vector<64x128xf32>
    %cst_84 = arith.constant 0.000000e+00 : f32
    %124 = vector.broadcast %cst_84 : f32 to vector<64x128xf32>
    %125 = arith.maximumf %123, %124 : vector<64x128xf32>
    %126 = arith.truncf %125 : vector<64x128xf32> to vector<64x128xbf16>
    %c13 = arith.constant 13 : index
    %c0_85 = arith.constant 0 : index
    %c0_86 = arith.constant 0 : index
    %127 = vector.load %arg4[%c13, %c0_85, %c0_86] : memref<14x128x128xbf16, #tpu.memory_space<vmem>>, vector<1x128x128xbf16>
    %128 = vector.shape_cast %127 : vector<1x128x128xbf16> to vector<128x128xbf16>
    %cst_87 = arith.constant dense<0.000000e+00> : vector<64x128xf32>
    %129 = tpu.matmul %126, %128, %cst_87 {dimension_numbers = #tpu.dot_dimension_numbers<[1], [0], [0], [1], [0, 0, 1, 1], [], []>} : vector<64x128xbf16>, vector<128x128xbf16>, vector<64x128xf32> -> vector<64x128xf32>
    %c13_88 = arith.constant 13 : index
    %c0_89 = arith.constant 0 : index
    %130 = vector.load %arg5[%c13_88, %c0_89] : memref<14x128xf32, #tpu.memory_space<vmem>>, vector<1x128xf32>
    %131 = vector.broadcast %130 : vector<1x128xf32> to vector<64x128xf32>
    %132 = arith.addf %129, %131 : vector<64x128xf32>
    %cst_90 = arith.constant 0.000000e+00 : f32
    %133 = vector.broadcast %cst_90 : f32 to vector<64x128xf32>
    %134 = arith.maximumf %132, %133 : vector<64x128xf32>
    %135 = arith.truncf %134 : vector<64x128xf32> to vector<64x128xbf16>
    %c0_91 = arith.constant 0 : index
    %c0_92 = arith.constant 0 : index
    %136 = vector.load %arg6[%c0_91, %c0_92] : memref<128x24xbf16, #tpu.memory_space<vmem>>, vector<128x24xbf16>
    %cst_93 = arith.constant dense<0.000000e+00> : vector<64x24xf32>
    %137 = tpu.matmul %135, %136, %cst_93 {dimension_numbers = #tpu.dot_dimension_numbers<[1], [0], [0], [1], [0, 0, 1, 1], [], []>} : vector<64x128xbf16>, vector<128x24xbf16>, vector<64x24xf32> -> vector<64x24xf32>
    %c0_94 = arith.constant 0 : index
    %c0_95 = arith.constant 0 : index
    %138 = vector.load %arg7[%c0_94, %c0_95] : memref<1x24xf32, #tpu.memory_space<vmem>>, vector<1x24xf32>
    %139 = vector.broadcast %138 : vector<1x24xf32> to vector<64x24xf32>
    %140 = arith.addf %137, %139 : vector<64x24xf32>
    %c0_96 = arith.constant 0 : index
    %c0_97 = arith.constant 0 : index
    %141 = vector.load %arg8[%c0_96, %c0_97] : memref<64x24xf32, #tpu.memory_space<vmem>>, vector<64x24xf32>
    tpu.vector_store %arg8[%c0_96, %c0_97], %140 {strides = array<i32>} : memref<64x24xf32, #tpu.memory_space<vmem>>, vector<64x24xf32>,
    return
  }
  func.func @transform_0(%arg0: i32) -> (i32, i32) {
    %c0_i32 = arith.constant 0 : i32
    %c0_i32_0 = arith.constant 0 : i32
    return %arg0, %c0_i32 : i32, i32
  }
  func.func @transform_1(%arg0: i32) -> (i32, i32) {
    %c0_i32 = arith.constant 0 : i32
    %c0_i32_0 = arith.constant 0 : i32
    %c0_i32_1 = arith.constant 0 : i32
    return %c0_i32, %c0_i32_0 : i32, i32
  }
  func.func @transform_2(%arg0: i32) -> (i32, i32) {
    %c0_i32 = arith.constant 0 : i32
    %c0_i32_0 = arith.constant 0 : i32
    %c0_i32_1 = arith.constant 0 : i32
    return %c0_i32, %c0_i32_0 : i32, i32
  }
  func.func @transform_3(%arg0: i32) -> (i32, i32, i32) {
    %c0_i32 = arith.constant 0 : i32
    %c0_i32_0 = arith.constant 0 : i32
    %c0_i32_1 = arith.constant 0 : i32
    %c0_i32_2 = arith.constant 0 : i32
    return %c0_i32, %c0_i32_0, %c0_i32_1 : i32, i32, i32
  }
  func.func @transform_4(%arg0: i32) -> (i32, i32) {
    %c0_i32 = arith.constant 0 : i32
    %c0_i32_0 = arith.constant 0 : i32
    %c0_i32_1 = arith.constant 0 : i32
    return %c0_i32, %c0_i32_0 : i32, i32
  }
  func.func @transform_5(%arg0: i32) -> (i32, i32) {
    %c0_i32 = arith.constant 0 : i32
    %c0_i32_0 = arith.constant 0 : i32
    %c0_i32_1 = arith.constant 0 : i32
    return %c0_i32, %c0_i32_0 : i32, i32
  }
  func.func @transform_6(%arg0: i32) -> (i32, i32) {
    %c0_i32 = arith.constant 0 : i32
    %c0_i32_0 = arith.constant 0 : i32
    %c0_i32_1 = arith.constant 0 : i32
    return %c0_i32, %c0_i32_0 : i32, i32
  }
  func.func @transform_7(%arg0: i32) -> (i32, i32) {
    %c0_i32 = arith.constant 0 : i32
    %c0_i32_0 = arith.constant 0 : i32
    return %arg0, %c0_i32 : i32, i32
  }
}

</mosaic_0001>

<bundles_post_ra>
// kernel: tpu_custom_call.1
= control target key start
LH: loop header
LB: loop body
LE: loop exit
PB: predicated region body
PF: predicated region fallthrough
CT: control target
= control target key end

     0   :  { %12 = vsyncpa [#allocation3], 0  ;;  %s2814_s24 = smov 0   ;;  %s2931_s0 = inlined_call_operand.vmem [shape: f32[128,24], index: 0, kind: input, shape index: {}]   ;;  %s2932_s1 = inlined_call_operand.vmem [shape: bf16[24,128], index: 1, kind: input, shape index: {}]   ;;  %s2933_s2 = inlined_call_operand.vmem [shape: f32[1,128], index: 2, kind: input, shape index: {}]   ;;  %s2934_s3 = inlined_call_operand.hbm [shape: bf16[14,128,128], index: 3, kind: input, shape index: {}]   ;;  %s2935_s4 = inlined_call_operand.vmem [shape: f32[14,128], index: 4, kind: input, shape index: {}]   ;;  %s2936_s5 = inlined_call_operand.vmem [shape: bf16[128,24], index: 5, kind: input, shape index: {}]   ;;  %s2937_s6 = inlined_call_operand.vmem [shape: f32[1,24], index: 6, kind: input, shape index: {}]   ;;  %s2938_s7 = inlined_call_operand.vmem [shape: f32[128,24], index: 7, kind: output, shape index: {}]  }
   0x1 LB: > { %s218_s27 = sshll.u32 %s2934_s3, 4  ;;  %s2070_s28 = sadd.s32 4294967295, %s2769_s24   ;;  %s2769_s24 = sphi %s2814_s24, %s18_s24   ;;  %s219_s27 = int_to_ptr.hbm [resolvable:$true] %s218_s27 }
   0x2   : > { %p2072_p0 = scmp.ge.s32.totalorder %s2769_s24, 1  ;;  %p201_p1 = scmp.lt.s32.totalorder %s2769_s24, 3 }
   0x3   : > { %p2700_p2 = scmp.eq.s32.totalorder %s2070_s28, 0  ;;  %s2771_s29 = smov [#allocation2]  }
   0x4   : > { %p202_p3 = pnand %p2072_p0, %p201_p1  ;;  %s220_s30 = sshll.u32 %s2771_s29, 4  ;;  %s221_s30 = int_to_ptr.vmem [resolvable:$true] %s220_s30 }
   0x5   : > { %s2772_s8 = smov 64   ;;  %s2773_s9 = smov 4  }
   0x6   : > { %p2696_p4 = pneg %p202_p3  ;;  %254 = sbr.rel (%p202_p3) target bundleno = 2358 (0x936), region = 48 }
   0x8   : > { %p2697_p5 = pnand %p2700_p2, %p2696_p4 }
   0xa   : > { %2699 = dma.hbm_to_vmem [thread:$0]  (!%p2697_p5), %s219_s27, 14336, %s221_s30, [#allocation3], %s2772_s8, %s2772_s8, %s2773_s9  }
   0xb   : > { %2764 = dma.done.wait (%p2700_p2), [#allocation3], 14336  }
   0xc   : > { %2766 = vsyncadd (%p2700_p2), [#allocation3], 4294952960  ;;  %s2077_s10 = sshll.u32 %s2070_s28, 3  ;;  %v314_v0 = vld [vmem:[%s2932_s1 + $0x8] sm:$0xf]  ;;  %vm341_vm0 = vcmask 1043456  }
   0xd   : > { %p288_p6 = scmp.lt.s32.totalorder %s2077_s10, 15  ;;  %v324_v1 = vunpack.c.l.b16 %v314_v0  ;;  %v2571_v3 = vld [vmem:[%s2932_s1] sm:$0xff]  ;;  %vm328_vm1 = vcmask 195584   ;;  %v2579_v11 = vld [vmem:[#allocation2 + $0x38] sm:$0xff]  ;;  %v2578_v12 = vld [vmem:[#allocation2 + $0x30] sm:$0xff] }
   0xe   : > { %452 = vmatpush.bf16.msra.mxu1 %v2579_v11  ;;  %v2577_v13 = vld [vmem:[#allocation2 + $0x28] sm:$0xff]  ;;  %v2576_v16 = vld [vmem:[#allocation2 + $0x20] sm:$0xff]  ;;  %v2575_v21 = vld [vmem:[#allocation2 + $0x18] sm:$0xff] }
   0xf   : > { %s2940_s10 = smov (!%p288_p6, %s2077_s10), 15  ;;  %v326_v2 = vpack.c.b16 %v324_v1, %v324_v1  ;;  %v2574_v22 = vld [vmem:[#allocation2 + $0x10] sm:$0xff]  ;;  %v2573_v23 = vld [vmem:[#allocation2 + $0x8] sm:$0xff]  ;;  %v2572_v24 = vld [vmem:[#allocation2] sm:$0xff] }
  0x10   : > { %s2078_s11 = sshll.u32 %s2940_s10, 3  ;;  %v2713_v26 = vld [vmem:[%s2933_s2] ss:$0 sm:$0xff]  ;;  %v2587_v40 = vld [vmem:[#allocation2 + $0x78] sm:$0xff]  ;;  %v2586_v42 = vld [vmem:[#allocation2 + $0x70] sm:$0xff] }
  0x11   : > { %s291_s16 = scalar_lea.vmem %s2931_s0, %s2078_s11  ;;  %v343_v5 = vsel %vm341_vm0, %v326_v2, 0  ;;  %560 = vmatpush.bf16.msra.mxu2 %v2587_v40  ;;  %v2585_v43 = vld [vmem:[#allocation2 + $0x68] sm:$0xff]  ;;  %v2584_v47 = vld [vmem:[#allocation2 + $0x60] sm:$0xff]  ;;  %v2583_v58 = vld [vmem:[#allocation2 + $0x58] sm:$0xff]  ;;  %s297_s30 = scalar_lea.vmem %s2938_s7, %s2078_s11 }
  0x12   : > { %v300_v4 = vld [vmem:[%s291_s16] sm:$0xff]  ;;  %v301_v6 = vld [vmem:[%s291_s16 + $0x8] sm:$0xff]  ;;  %351 = vmatpush.bf16.msra.mxu0 %v343_v5  ;;  %v302_v8 = vld [vmem:[%s291_s16 + $0x10] sm:$0xff]  ;;  %453 = vmatpush.bf16.msra.mxu1 %v2578_v12 }
  0x13   : > { %v308_v7 = vpack.c.bf16 %v301_v6, %v300_v4  ;;  %v303_v9 = vld [vmem:[%s291_s16 + $0x18] sm:$0xff]  ;;  %v304_v14 = vld [vmem:[%s291_s16 + $0x20] sm:$0xff]  ;;  %v305_v15 = vld [vmem:[%s291_s16 + $0x28] sm:$0xff] }
  0x14   : > { %v309_v10 = vpack.c.bf16 %v303_v9, %v302_v8  ;;  %v310_v17 = vpack.c.bf16 %v305_v15, %v304_v14  ;;  %v306_v18 = vld [vmem:[%s291_s16 + $0x30] sm:$0xff]  ;;  %v307_v19 = vld [vmem:[%s291_s16 + $0x38] sm:$0xff]  ;;  %v2581_v60 = vld [vmem:[#allocation2 + $0x48] sm:$0xff] }
  0x15   : > { %v311_v20 = vpack.c.bf16 %v307_v19, %v306_v18  ;;  %561 = vmatpush.bf16.msra.mxu2 %v2586_v42  ;;  %v2582_v59 = vld [vmem:[#allocation2 + $0x50] sm:$0xff]  ;;  %v2580_v61 = vld [vmem:[#allocation2 + $0x40] sm:$0xff] }
  0x16   : > { %352 = vmatpush.bf16.msra.mxu0 %v2571_v3  ;;  %454 = vmatpush.bf16.msra.mxu1 %v2577_v13  ;;  %v2714_v63 = vld [vmem:[%s2935_s4] ss:$0 sm:$0xff]  ;;  %v2595_v13 = vld [vmem:[#allocation2 + $0xb8] sm:$0xff]  ;;  %v2594_v15 = vld [vmem:[#allocation2 + $0xb0] sm:$0xff] }
  0x17   : > { %668 = vmatpush.bf16.msra.mxu3 %v2595_v13 }
  0x19   : > { %2085 = vmatmul.msk.bf16.vlgmr.msra.gmra.mxu0 %vm328_vm1, %v308_v7  ;;  %562 = vmatpush.bf16.msra.mxu2 %v2585_v43 }
  0x1a   : > { %455 = vmatpush.bf16.msra.mxu1 %v2576_v16  ;;  %v2593_v16 = vld [vmem:[#allocation2 + $0xa8] sm:$0xff] }
  0x1b   : > { %669 = vmatpush.bf16.msra.mxu3 %v2594_v15 }
  0x1d   : > { %563 = vmatpush.bf16.msra.mxu2 %v2584_v47 }
  0x1e   : > { %456 = vmatpush.bf16.msra.mxu1 %v2575_v21 }
  0x1f   : > { %670 = vmatpush.bf16.msra.mxu3 %v2593_v16 }
  0x21   : > { %564 = vmatpush.bf16.msra.mxu2 %v2583_v58 }
  0x22   : > { %457 = vmatpush.bf16.msra.mxu1 %v2574_v22 }
  0x25   : > { %565 = vmatpush.bf16.msra.mxu2 %v2582_v59 }
  0x26   : > { %458 = vmatpush.bf16.msra.mxu1 %v2573_v23 }
  0x29   : > { %2086 = vmatmul.msk.bf16.gmra.mxu0 %vm328_vm1, %v309_v10  ;;  %566 = vmatpush.bf16.msra.mxu2 %v2581_v60 }
  0x2a   : > { %459 = vmatpush.bf16.msra.mxu1 %v2572_v24 }
  0x2d   : > { %567 = vmatpush.bf16.msra.mxu2 %v2580_v61  ;;  %v2599_v61 = vld [vmem:[#allocation2 + $0xd8] sm:$0xff] }
  0x39   : > { %2087 = vmatmul.msk.bf16.gmra.mxu0 %vm328_vm1, %v310_v17 }
  0x49   : > { %2088 = vmatmul.msk.bf16.gmra.mxu0 %vm328_vm1, %v311_v20  ;;  %v2592_v20 = vld [vmem:[#allocation2 + $0xa0] sm:$0xff] }
  0x4a   : > { %671 = vmatpush.bf16.msra.mxu3 %v2592_v20 }
  0x96   : > { %v354_v25 = vpop.f32.mrf.mxu0 }
  0x97   : > { %v355_v27 = vadd.f32 %v2713_v26, %v354_v25 }
  0x99   : > { %v374_v30 = vmax.f32 %v355_v27, 0.0 }
  0x9e   : > { %v356_v28 = vpop.f32.mrf.mxu0 }
  0x9f   : > { %v357_v29 = vadd.f32 %v2713_v26, %v356_v28 }
  0xa1   : > { %v375_v31 = vmax.f32 %v357_v29, 0.0 }
  0xa3   : > { %v382_v32 = vpack.c.bf16 %v375_v31, %v374_v30  ;;  %v2591_v31 = vld [vmem:[#allocation2 + $0x98] sm:$0xff] }
  0xa4   : > { %672 = vmatpush.bf16.msra.mxu3 %v2591_v31 }
  0xa5   : > { %460 = vmatmul.bf16.vlgmr.msra.gmra.mxu1 %v382_v32  ;;  %v2590_v32 = vld [vmem:[#allocation2 + $0x90] sm:$0xff] }
  0xa6   : > { %v359_v33 = vpop.f32.mrf.mxu0 }
  0xa7   : > { %v360_v34 = vadd.f32 %v2713_v26, %v359_v33  ;;  %v2589_v33 = vld [vmem:[#allocation2 + $0x88] sm:$0xff] }
  0xa8   : > { %673 = vmatpush.bf16.msra.mxu3 %v2590_v32 }
  0xa9   : > { %v376_v37 = vmax.f32 %v360_v34, 0.0  ;;  %v2588_v34 = vld [vmem:[#allocation2 + $0x80] sm:$0xff] }
  0xac   : > { %674 = vmatpush.bf16.msra.mxu3 %v2589_v33 }
  0xae   : > { %v361_v35 = vpop.f32.mrf.mxu0 }
  0xaf   : > { %v362_v36 = vadd.f32 %v2713_v26, %v361_v35 }
  0xb0   : > { %675 = vmatpush.bf16.msra.mxu3 %v2588_v34  ;;  %v2607_v34 = vld [vmem:[#allocation2 + $0x118] sm:$0xff] }
  0xb1   : > { %v377_v38 = vmax.f32 %v362_v36, 0.0  ;;  %v2715_v36 = vld [vmem:[%s2935_s4 + $0x1] ss:$0 sm:$0xff] }
  0xb3   : > { %v383_v39 = vpack.c.bf16 %v377_v38, %v376_v37 }
  0xb5   : > { %465 = vmatmul.bf16.gmra.mxu1 %v383_v39 }
  0xb6   : > { %v364_v41 = vpop.f32.mrf.mxu0 }
  0xb7   : > { %v365_v44 = vadd.f32 %v2713_v26, %v364_v41 }
  0xb9   : > { %v378_v48 = vmax.f32 %v365_v44, 0.0 }
  0xbe   : > { %v366_v45 = vpop.f32.mrf.mxu0 }
  0xbf   : > { %v367_v46 = vadd.f32 %v2713_v26, %v366_v45 }
  0xc1   : > { %v379_v49 = vmax.f32 %v367_v46, 0.0 }
  0xc3   : > { %v384_v50 = vpack.c.bf16 %v379_v49, %v378_v48 }
  0xc5   : > { %470 = vmatmul.bf16.gmra.mxu1 %v384_v50  ;;  %v2603_v50 = vld [vmem:[#allocation2 + $0xf8] sm:$0xff] }
  0xc6   : > { %v369_v51 = vpop.f32.mrf.mxu0  ;;  %776 = vmatpush.bf16.msrb.mxu0 %v2603_v50 }
  0xc7   : > { %v370_v52 = vadd.f32 %v2713_v26, %v369_v51 }
  0xc9   : > { %v380_v55 = vmax.f32 %v370_v52, 0.0  ;;  %v2602_v52 = vld [vmem:[#allocation2 + $0xf0] sm:$0xff] }
  0xca   : > { %777 = vmatpush.bf16.msrb.mxu0 %v2602_v52 }
  0xce   : > { %v371_v53 = vpop.f32.mrf.mxu0 }
  0xcf   : > { %v372_v54 = vadd.f32 %v2713_v26, %v371_v53  ;;  %v2601_v53 = vld [vmem:[#allocation2 + $0xe8] sm:$0xff] }
  0xd0   : > { %778 = vmatpush.bf16.msrb.mxu0 %v2601_v53 }
  0xd1   : > { %v381_v56 = vmax.f32 %v372_v54, 0.0 }
  0xd3   : > { %v385_v57 = vpack.c.bf16 %v381_v56, %v380_v55 }
  0xd5   : > { %475 = vmatmul.bf16.gmra.mxu1 %v385_v57  ;;  %v2600_v57 = vld [vmem:[#allocation2 + $0xe0] sm:$0xff] }
  0xd6   : > { %779 = vmatpush.bf16.msrb.mxu0 %v2600_v57 }
  0xda   : > { %780 = vmatpush.bf16.msrb.mxu0 %v2599_v61 }
 0x122   : > { %v461_v62 = vpop.f32.mrf.mxu1 }
 0x123   : > { %v462_v0 = vadd.f32 %v2714_v63, %v461_v62 }
 0x125   : > { %v481_v3 = vmax.f32 %v462_v0, 0.0  ;;  %v2597_v0 = vld [vmem:[#allocation2 + $0xc8] sm:$0xff] }
 0x12a   : > { %v463_v1 = vpop.f32.mrf.mxu1 }
 0x12b   : > { %v464_v2 = vadd.f32 %v2714_v63, %v463_v1 }
 0x12d   : > { %v482_v4 = vmax.f32 %v464_v2, 0.0 }
 0x12f   : > { %v489_v5 = vpack.c.bf16 %v482_v4, %v481_v3 }
 0x131   : > { %568 = vmatmul.bf16.vlgmr.msra.gmra.mxu2 %v489_v5 }
 0x132   : > { %v466_v6 = vpop.f32.mrf.mxu1 }
 0x133   : > { %v467_v7 = vadd.f32 %v2714_v63, %v466_v6 }
 0x135   : > { %v483_v10 = vmax.f32 %v467_v7, 0.0  ;;  %v2596_v7 = vld [vmem:[#allocation2 + $0xc0] sm:$0xff] }
 0x13a   : > { %v468_v8 = vpop.f32.mrf.mxu1 }
 0x13b   : > { %v469_v9 = vadd.f32 %v2714_v63, %v468_v8 }
 0x13d   : > { %v484_v11 = vmax.f32 %v469_v9, 0.0  ;;  %v2716_v9 = vld [vmem:[%s2935_s4 + $0x2] ss:$0 sm:$0xff] }
 0x13f   : > { %v490_v12 = vpack.c.bf16 %v484_v11, %v483_v10 }
 0x141   : > { %573 = vmatmul.bf16.gmra.mxu2 %v490_v12 }
 0x142   : > { %v471_v14 = vpop.f32.mrf.mxu1 }
 0x143   : > { %v472_v17 = vadd.f32 %v2714_v63, %v471_v14 }
 0x145   : > { %v485_v21 = vmax.f32 %v472_v17, 0.0 }
 0x14a   : > { %v473_v18 = vpop.f32.mrf.mxu1 }
 0x14b   : > { %v474_v19 = vadd.f32 %v2714_v63, %v473_v18 }
 0x14d   : > { %v486_v22 = vmax.f32 %v474_v19, 0.0 }
 0x14f   : > { %v491_v23 = vpack.c.bf16 %v486_v22, %v485_v21 }
 0x151   : > { %578 = vmatmul.bf16.gmra.mxu2 %v491_v23  ;;  %v2611_v23 = vld [vmem:[#allocation2 + $0x138] sm:$0xff] }
 0x152   : > { %v476_v24 = vpop.f32.mrf.mxu1  ;;  %884 = vmatpush.bf16.msrb.mxu1 %v2611_v23 }
 0x153   : > { %v477_v25 = vadd.f32 %v2714_v63, %v476_v24 }
 0x155   : > { %v487_v28 = vmax.f32 %v477_v25, 0.0  ;;  %v2610_v25 = vld [vmem:[#allocation2 + $0x130] sm:$0xff] }
 0x156   : > { %885 = vmatpush.bf16.msrb.mxu1 %v2610_v25 }
 0x15a   : > { %v478_v26 = vpop.f32.mrf.mxu1 }
 0x15b   : > { %v479_v27 = vadd.f32 %v2714_v63, %v478_v26  ;;  %v2598_v63 = vld [vmem:[#allocation2 + $0xd0] sm:$0xff]  ;;  %v2609_v26 = vld [vmem:[#allocation2 + $0x128] sm:$0xff] }
 0x15c   : > { %781 = vmatpush.bf16.msrb.mxu0 %v2598_v63  ;;  %886 = vmatpush.bf16.msrb.mxu1 %v2609_v26  ;;  %v2617_v63 = vld [vmem:[#allocation2 + $0x168] sm:$0xff] }
 0x15d   : > { %v488_v29 = vmax.f32 %v479_v27, 0.0 }
 0x15f   : > { %v492_v30 = vpack.c.bf16 %v488_v29, %v487_v28 }
 0x160   : > { %782 = vmatpush.bf16.msrb.mxu0 %v2597_v0 }
 0x161   : > { %583 = vmatmul.bf16.gmra.mxu2 %v492_v30  ;;  %v2608_v30 = vld [vmem:[#allocation2 + $0x120] sm:$0xff] }
 0x162   : > { %887 = vmatpush.bf16.msrb.mxu1 %v2608_v30 }
 0x164   : > { %783 = vmatpush.bf16.msrb.mxu0 %v2596_v7  ;;  %v2615_v7 = vld [vmem:[#allocation2 + $0x158] sm:$0xff] }
 0x166   : > { %888 = vmatpush.bf16.msrb.mxu1 %v2607_v34 }
 0x1b4   : > { %v569_v35 = vpop.f32.mrf.mxu2 }
 0x1b5   : > { %v570_v37 = vadd.f32 %v2715_v36, %v569_v35 }
 0x1b7   : > { %v589_v40 = vmax.f32 %v570_v37, 0.0  ;;  %v2605_v37 = vld [vmem:[#allocation2 + $0x108] sm:$0xff] }
 0x1bc   : > { %v571_v38 = vpop.f32.mrf.mxu2 }
 0x1bd   : > { %v572_v39 = vadd.f32 %v2715_v36, %v571_v38 }
 0x1bf   : > { %v590_v41 = vmax.f32 %v572_v39, 0.0 }
 0x1c1   : > { %v597_v42 = vpack.c.bf16 %v590_v41, %v589_v40 }
 0x1c3   : > { %676 = vmatmul.bf16.vlgmr.msra.gmra.mxu3 %v597_v42 }
 0x1c4   : > { %v574_v43 = vpop.f32.mrf.mxu2 }
 0x1c5   : > { %v575_v44 = vadd.f32 %v2715_v36, %v574_v43 }
 0x1c7   : > { %v591_v47 = vmax.f32 %v575_v44, 0.0  ;;  %v2604_v44 = vld [vmem:[#allocation2 + $0x100] sm:$0xff] }
 0x1cc   : > { %v576_v45 = vpop.f32.mrf.mxu2 }
 0x1cd   : > { %v577_v46 = vadd.f32 %v2715_v36, %v576_v45 }
 0x1cf   : > { %v592_v48 = vmax.f32 %v577_v46, 0.0  ;;  %v2717_v46 = vld [vmem:[%s2935_s4 + $0x3] ss:$0 sm:$0xff] }
 0x1d1   : > { %v598_v49 = vpack.c.bf16 %v592_v48, %v591_v47 }
 0x1d3   : > { %681 = vmatmul.bf16.gmra.mxu3 %v598_v49 }
 0x1d4   : > { %v579_v51 = vpop.f32.mrf.mxu2 }
 0x1d5   : > { %v580_v54 = vadd.f32 %v2715_v36, %v579_v51 }
 0x1d7   : > { %v593_v58 = vmax.f32 %v580_v54, 0.0 }
 0x1dc   : > { %v581_v55 = vpop.f32.mrf.mxu2 }
 0x1dd   : > { %v582_v56 = vadd.f32 %v2715_v36, %v581_v55 }
 0x1df   : > { %v594_v59 = vmax.f32 %v582_v56, 0.0 }
 0x1e1   : > { %v599_v60 = vpack.c.bf16 %v594_v59, %v593_v58 }
 0x1e3   : > { %686 = vmatmul.bf16.gmra.mxu3 %v599_v60  ;;  %v2619_v60 = vld [vmem:[#allocation2 + $0x178] sm:$0xff] }
 0x1e4   : > { %v584_v62 = vpop.f32.mrf.mxu2  ;;  %992 = vmatpush.bf16.msrb.mxu2 %v2619_v60 }
 0x1e5   : > { %v585_v1 = vadd.f32 %v2715_v36, %v584_v62  ;;  %v2618_v62 = vld [vmem:[#allocation2 + $0x170] sm:$0xff] }
 0x1e7   : > { %v595_v4 = vmax.f32 %v585_v1, 0.0 }
 0x1e8   : > { %993 = vmatpush.bf16.msrb.mxu2 %v2618_v62 }
 0x1ec   : > { %v586_v2 = vpop.f32.mrf.mxu2  ;;  %994 = vmatpush.bf16.msrb.mxu2 %v2617_v63 }
 0x1ed   : > { %v587_v3 = vadd.f32 %v2715_v36, %v586_v2  ;;  %v2606_v36 = vld [vmem:[#allocation2 + $0x110] sm:$0xff] }
 0x1ee   : > { %889 = vmatpush.bf16.msrb.mxu1 %v2606_v36  ;;  %v2625_v36 = vld [vmem:[#allocation2 + $0x1a8] sm:$0xff] }
 0x1ef   : > { %v596_v5 = vmax.f32 %v587_v3, 0.0  ;;  %v2616_v3 = vld [vmem:[#allocation2 + $0x160] sm:$0xff] }
 0x1f0   : > { %995 = vmatpush.bf16.msrb.mxu2 %v2616_v3 }
 0x1f1   : > { %v600_v6 = vpack.c.bf16 %v596_v5, %v595_v4 }
 0x1f2   : > { %890 = vmatpush.bf16.msrb.mxu1 %v2605_v37 }
 0x1f3   : > { %691 = vmatmul.bf16.gmra.mxu3 %v600_v6 }
 0x1f4   : > { %996 = vmatpush.bf16.msrb.mxu2 %v2615_v7 }
 0x1f6   : > { %891 = vmatpush.bf16.msrb.mxu1 %v2604_v44  ;;  %v2623_v44 = vld [vmem:[#allocation2 + $0x198] sm:$0xff] }
 0x246   : > { %v677_v8 = vpop.f32.mrf.mxu3 }
 0x247   : > { %v678_v10 = vadd.f32 %v2716_v9, %v677_v8 }
 0x249   : > { %v697_v13 = vmax.f32 %v678_v10, 0.0  ;;  %v2613_v10 = vld [vmem:[#allocation2 + $0x148] sm:$0xff] }
 0x24e   : > { %v679_v11 = vpop.f32.mrf.mxu3 }
 0x24f   : > { %v680_v12 = vadd.f32 %v2716_v9, %v679_v11 }
 0x251   : > { %v698_v14 = vmax.f32 %v680_v12, 0.0 }
 0x253   : > { %v705_v15 = vpack.c.bf16 %v698_v14, %v697_v13 }
 0x255   : > { %784 = vmatmul.bf16.vlgmr.msrb.gmra.mxu0 %v705_v15 }
 0x256   : > { %v682_v16 = vpop.f32.mrf.mxu3 }
 0x257   : > { %v683_v17 = vadd.f32 %v2716_v9, %v682_v16 }
 0x259   : > { %v699_v20 = vmax.f32 %v683_v17, 0.0  ;;  %v2612_v17 = vld [vmem:[#allocation2 + $0x140] sm:$0xff] }
 0x25e   : > { %v684_v18 = vpop.f32.mrf.mxu3 }
 0x25f   : > { %v685_v19 = vadd.f32 %v2716_v9, %v684_v18 }
 0x261   : > { %v700_v21 = vmax.f32 %v685_v19, 0.0  ;;  %v2718_v19 = vld [vmem:[%s2935_s4 + $0x4] ss:$0 sm:$0xff] }
 0x263   : > { %v706_v22 = vpack.c.bf16 %v700_v21, %v699_v20 }
 0x265   : > { %789 = vmatmul.bf16.gmra.mxu0 %v706_v22 }
 0x266   : > { %v687_v24 = vpop.f32.mrf.mxu3 }
 0x267   : > { %v688_v27 = vadd.f32 %v2716_v9, %v687_v24 }
 0x269   : > { %v701_v31 = vmax.f32 %v688_v27, 0.0 }
 0x26e   : > { %v689_v28 = vpop.f32.mrf.mxu3 }
 0x26f   : > { %v690_v29 = vadd.f32 %v2716_v9, %v689_v28 }
 0x271   : > { %v702_v32 = vmax.f32 %v690_v29, 0.0 }
 0x273   : > { %v707_v33 = vpack.c.bf16 %v702_v32, %v701_v31 }
 0x275   : > { %794 = vmatmul.bf16.gmra.mxu0 %v707_v33  ;;  %v2627_v33 = vld [vmem:[#allocation2 + $0x1b8] sm:$0xff] }
 0x276   : > { %v692_v35 = vpop.f32.mrf.mxu3  ;;  %1100 = vmatpush.bf16.msrb.mxu3 %v2627_v33 }
 0x277   : > { %v693_v38 = vadd.f32 %v2716_v9, %v692_v35  ;;  %v2626_v35 = vld [vmem:[#allocation2 + $0x1b0] sm:$0xff] }
 0x279   : > { %v703_v41 = vmax.f32 %v693_v38, 0.0 }
 0x27a   : > { %1101 = vmatpush.bf16.msrb.mxu3 %v2626_v35 }
 0x27e   : > { %v694_v39 = vpop.f32.mrf.mxu3  ;;  %1102 = vmatpush.bf16.msrb.mxu3 %v2625_v36 }
 0x27f   : > { %v695_v40 = vadd.f32 %v2716_v9, %v694_v39  ;;  %v2614_v9 = vld [vmem:[#allocation2 + $0x150] sm:$0xff] }
 0x280   : > { %997 = vmatpush.bf16.msrb.mxu2 %v2614_v9  ;;  %v2633_v9 = vld [vmem:[#allocation2 + $0x1e8] sm:$0xff] }
 0x281   : > { %v704_v42 = vmax.f32 %v695_v40, 0.0  ;;  %v2624_v40 = vld [vmem:[#allocation2 + $0x1a0] sm:$0xff] }
 0x282   : > { %1103 = vmatpush.bf16.msrb.mxu3 %v2624_v40 }
 0x283   : > { %v708_v43 = vpack.c.bf16 %v704_v42, %v703_v41 }
 0x284   : > { %998 = vmatpush.bf16.msrb.mxu2 %v2613_v10 }
 0x285   : > { %799 = vmatmul.bf16.gmra.mxu0 %v708_v43 }
 0x286   : > { %1104 = vmatpush.bf16.msrb.mxu3 %v2623_v44 }
 0x288   : > { %999 = vmatpush.bf16.msrb.mxu2 %v2612_v17  ;;  %v2631_v17 = vld [vmem:[#allocation2 + $0x1d8] sm:$0xff] }
 0x2d2   : > { %v785_v45 = vpop.f32.mrf.mxu0 }
 0x2d3   : > { %v786_v47 = vadd.f32 %v2717_v46, %v785_v45 }
 0x2d5   : > { %v805_v50 = vmax.f32 %v786_v47, 0.0  ;;  %v2621_v47 = vld [vmem:[#allocation2 + $0x188] sm:$0xff] }
 0x2da   : > { %v787_v48 = vpop.f32.mrf.mxu0 }
 0x2db   : > { %v788_v49 = vadd.f32 %v2717_v46, %v787_v48 }
 0x2dd   : > { %v806_v51 = vmax.f32 %v788_v49, 0.0 }
 0x2df   : > { %v813_v52 = vpack.c.bf16 %v806_v51, %v805_v50 }
 0x2e1   : > { %892 = vmatmul.bf16.vlgmr.msrb.gmra.mxu1 %v813_v52 }
 0x2e2   : > { %v790_v53 = vpop.f32.mrf.mxu0 }
 0x2e3   : > { %v791_v54 = vadd.f32 %v2717_v46, %v790_v53 }
 0x2e5   : > { %v807_v57 = vmax.f32 %v791_v54, 0.0  ;;  %v2620_v54 = vld [vmem:[#allocation2 + $0x180] sm:$0xff] }
 0x2ea   : > { %v792_v55 = vpop.f32.mrf.mxu0 }
 0x2eb   : > { %v793_v56 = vadd.f32 %v2717_v46, %v792_v55 }
 0x2ed   : > { %v808_v58 = vmax.f32 %v793_v56, 0.0  ;;  %v2719_v56 = vld [vmem:[%s2935_s4 + $0x5] ss:$0 sm:$0xff] }
 0x2ef   : > { %v814_v59 = vpack.c.bf16 %v808_v58, %v807_v57 }
 0x2f1   : > { %897 = vmatmul.bf16.gmra.mxu1 %v814_v59 }
 0x2f2   : > { %v795_v61 = vpop.f32.mrf.mxu0 }
 0x2f3   : > { %v796_v0 = vadd.f32 %v2717_v46, %v795_v61 }
 0x2f5   : > { %v809_v4 = vmax.f32 %v796_v0, 0.0 }
 0x2fa   : > { %v797_v1 = vpop.f32.mrf.mxu0 }
 0x2fb   : > { %v798_v2 = vadd.f32 %v2717_v46, %v797_v1 }
 0x2fd   : > { %v810_v5 = vmax.f32 %v798_v2, 0.0 }
 0x2ff   : > { %v815_v6 = vpack.c.bf16 %v810_v5, %v809_v4 }
 0x301   : > { %902 = vmatmul.bf16.gmra.mxu1 %v815_v6  ;;  %v2635_v6 = vld [vmem:[#allocation2 + $0x1f8] sm:$0xff] }
 0x302   : > { %v800_v8 = vpop.f32.mrf.mxu0  ;;  %1208 = vmatpush.bf16.msra.mxu0 %v2635_v6 }
 0x303   : > { %v801_v11 = vadd.f32 %v2717_v46, %v800_v8  ;;  %v2634_v8 = vld [vmem:[#allocation2 + $0x1f0] sm:$0xff] }
 0x305   : > { %v811_v14 = vmax.f32 %v801_v11, 0.0 }
 0x306   : > { %1209 = vmatpush.bf16.msra.mxu0 %v2634_v8 }
 0x30a   : > { %v802_v12 = vpop.f32.mrf.mxu0  ;;  %1210 = vmatpush.bf16.msra.mxu0 %v2633_v9 }
 0x30b   : > { %v803_v13 = vadd.f32 %v2717_v46, %v802_v12  ;;  %v2622_v46 = vld [vmem:[#allocation2 + $0x190] sm:$0xff] }
 0x30c   : > { %1105 = vmatpush.bf16.msrb.mxu3 %v2622_v46  ;;  %v2641_v46 = vld [vmem:[#allocation2 + $0x228] sm:$0xff] }
 0x30d   : > { %v812_v15 = vmax.f32 %v803_v13, 0.0  ;;  %v2632_v13 = vld [vmem:[#allocation2 + $0x1e0] sm:$0xff] }
 0x30e   : > { %1211 = vmatpush.bf16.msra.mxu0 %v2632_v13 }
 0x30f   : > { %v816_v16 = vpack.c.bf16 %v812_v15, %v811_v14 }
 0x310   : > { %1106 = vmatpush.bf16.msrb.mxu3 %v2621_v47 }
 0x311   : > { %907 = vmatmul.bf16.gmra.mxu1 %v816_v16 }
 0x312   : > { %1212 = vmatpush.bf16.msra.mxu0 %v2631_v17 }
 0x314   : > { %1107 = vmatpush.bf16.msrb.mxu3 %v2620_v54  ;;  %v2639_v54 = vld [vmem:[#allocation2 + $0x218] sm:$0xff] }
 0x35e   : > { %v893_v18 = vpop.f32.mrf.mxu1 }
 0x35f   : > { %v894_v20 = vadd.f32 %v2718_v19, %v893_v18 }
 0x361   : > { %v913_v23 = vmax.f32 %v894_v20, 0.0  ;;  %v2629_v20 = vld [vmem:[#allocation2 + $0x1c8] sm:$0xff] }
 0x366   : > { %v895_v21 = vpop.f32.mrf.mxu1 }
 0x367   : > { %v896_v22 = vadd.f32 %v2718_v19, %v895_v21 }
 0x369   : > { %v914_v24 = vmax.f32 %v896_v22, 0.0 }
 0x36b   : > { %v921_v25 = vpack.c.bf16 %v914_v24, %v913_v23 }
 0x36d   : > { %1000 = vmatmul.bf16.vlgmr.msrb.gmra.mxu2 %v921_v25 }
 0x36e   : > { %v898_v26 = vpop.f32.mrf.mxu1 }
 0x36f   : > { %v899_v27 = vadd.f32 %v2718_v19, %v898_v26 }
 0x371   : > { %v915_v30 = vmax.f32 %v899_v27, 0.0  ;;  %v2628_v27 = vld [vmem:[#allocation2 + $0x1c0] sm:$0xff] }
 0x376   : > { %v900_v28 = vpop.f32.mrf.mxu1 }
 0x377   : > { %v901_v29 = vadd.f32 %v2718_v19, %v900_v28 }
 0x379   : > { %v916_v31 = vmax.f32 %v901_v29, 0.0  ;;  %v2720_v29 = vld [vmem:[%s2935_s4 + $0x6] ss:$0 sm:$0xff] }
 0x37b   : > { %v922_v32 = vpack.c.bf16 %v916_v31, %v915_v30 }
 0x37d   : > { %1005 = vmatmul.bf16.gmra.mxu2 %v922_v32 }
 0x37e   : > { %v903_v34 = vpop.f32.mrf.mxu1 }
 0x37f   : > { %v904_v37 = vadd.f32 %v2718_v19, %v903_v34 }
 0x381   : > { %v917_v41 = vmax.f32 %v904_v37, 0.0 }
 0x386   : > { %v905_v38 = vpop.f32.mrf.mxu1 }
 0x387   : > { %v906_v39 = vadd.f32 %v2718_v19, %v905_v38 }
 0x389   : > { %v918_v42 = vmax.f32 %v906_v39, 0.0 }
 0x38b   : > { %v923_v43 = vpack.c.bf16 %v918_v42, %v917_v41 }
 0x38d   : > { %1010 = vmatmul.bf16.gmra.mxu2 %v923_v43  ;;  %v2643_v43 = vld [vmem:[#allocation2 + $0x238] sm:$0xff] }
 0x38e   : > { %v908_v45 = vpop.f32.mrf.mxu1  ;;  %1316 = vmatpush.bf16.msra.mxu1 %v2643_v43 }
 0x38f   : > { %v909_v48 = vadd.f32 %v2718_v19, %v908_v45  ;;  %v2642_v45 = vld [vmem:[#allocation2 + $0x230] sm:$0xff] }
 0x391   : > { %v919_v51 = vmax.f32 %v909_v48, 0.0 }
 0x392   : > { %1317 = vmatpush.bf16.msra.mxu1 %v2642_v45 }
 0x396   : > { %v910_v49 = vpop.f32.mrf.mxu1  ;;  %1318 = vmatpush.bf16.msra.mxu1 %v2641_v46 }
 0x397   : > { %v911_v50 = vadd.f32 %v2718_v19, %v910_v49  ;;  %v2630_v19 = vld [vmem:[#allocation2 + $0x1d0] sm:$0xff] }
 0x398   : > { %1213 = vmatpush.bf16.msra.mxu0 %v2630_v19  ;;  %v2649_v19 = vld [vmem:[#allocation2 + $0x268] sm:$0xff] }
 0x399   : > { %v920_v52 = vmax.f32 %v911_v50, 0.0  ;;  %v2640_v50 = vld [vmem:[#allocation2 + $0x220] sm:$0xff] }
 0x39a   : > { %1319 = vmatpush.bf16.msra.mxu1 %v2640_v50 }
 0x39b   : > { %v924_v53 = vpack.c.bf16 %v920_v52, %v919_v51 }
 0x39c   : > { %1214 = vmatpush.bf16.msra.mxu0 %v2629_v20 }
 0x39d   : > { %1015 = vmatmul.bf16.gmra.mxu2 %v924_v53 }
 0x39e   : > { %1320 = vmatpush.bf16.msra.mxu1 %v2639_v54 }
 0x3a0   : > { %1215 = vmatpush.bf16.msra.mxu0 %v2628_v27  ;;  %v2647_v27 = vld [vmem:[#allocation2 + $0x258] sm:$0xff] }
 0x3f0   : > { %v1001_v55 = vpop.f32.mrf.mxu2 }
 0x3f1   : > { %v1002_v57 = vadd.f32 %v2719_v56, %v1001_v55 }
 0x3f3   : > { %v1021_v60 = vmax.f32 %v1002_v57, 0.0  ;;  %v2637_v57 = vld [vmem:[#allocation2 + $0x208] sm:$0xff] }
 0x3f8   : > { %v1003_v58 = vpop.f32.mrf.mxu2 }
 0x3f9   : > { %v1004_v59 = vadd.f32 %v2719_v56, %v1003_v58 }
 0x3fb   : > { %v1022_v61 = vmax.f32 %v1004_v59, 0.0 }
 0x3fd   : > { %v1029_v62 = vpack.c.bf16 %v1022_v61, %v1021_v60 }
 0x3ff   : > { %1108 = vmatmul.bf16.vlgmr.msrb.gmra.mxu3 %v1029_v62 }
 0x400   : > { %v1006_v63 = vpop.f32.mrf.mxu2 }
 0x401   : > { %v1007_v0 = vadd.f32 %v2719_v56, %v1006_v63 }
 0x403   : > { %v1023_v3 = vmax.f32 %v1007_v0, 0.0  ;;  %v2636_v0 = vld [vmem:[#allocation2 + $0x200] sm:$0xff] }
 0x408   : > { %v1008_v1 = vpop.f32.mrf.mxu2 }
 0x409   : > { %v1009_v2 = vadd.f32 %v2719_v56, %v1008_v1 }
 0x40b   : > { %v1024_v4 = vmax.f32 %v1009_v2, 0.0  ;;  %v2721_v2 = vld [vmem:[%s2935_s4 + $0x7] ss:$0 sm:$0xff] }
 0x40d   : > { %v1030_v5 = vpack.c.bf16 %v1024_v4, %v1023_v3 }
 0x40f   : > { %1113 = vmatmul.bf16.gmra.mxu3 %v1030_v5 }
 0x410   : > { %v1011_v7 = vpop.f32.mrf.mxu2 }
 0x411   : > { %v1012_v10 = vadd.f32 %v2719_v56, %v1011_v7 }
 0x413   : > { %v1025_v14 = vmax.f32 %v1012_v10, 0.0 }
 0x418   : > { %v1013_v11 = vpop.f32.mrf.mxu2 }
 0x419   : > { %v1014_v12 = vadd.f32 %v2719_v56, %v1013_v11 }
 0x41b   : > { %v1026_v15 = vmax.f32 %v1014_v12, 0.0 }
 0x41d   : > { %v1031_v16 = vpack.c.bf16 %v1026_v15, %v1025_v14 }
 0x41f   : > { %1118 = vmatmul.bf16.gmra.mxu3 %v1031_v16  ;;  %v2651_v16 = vld [vmem:[#allocation2 + $0x278] sm:$0xff] }
 0x420   : > { %v1016_v18 = vpop.f32.mrf.mxu2  ;;  %1424 = vmatpush.bf16.msra.mxu2 %v2651_v16 }
 0x421   : > { %v1017_v21 = vadd.f32 %v2719_v56, %v1016_v18  ;;  %v2650_v18 = vld [vmem:[#allocation2 + $0x270] sm:$0xff] }
 0x423   : > { %v1027_v24 = vmax.f32 %v1017_v21, 0.0 }
 0x424   : > { %1425 = vmatpush.bf16.msra.mxu2 %v2650_v18 }
 0x428   : > { %v1018_v22 = vpop.f32.mrf.mxu2  ;;  %1426 = vmatpush.bf16.msra.mxu2 %v2649_v19 }
 0x429   : > { %v1019_v23 = vadd.f32 %v2719_v56, %v1018_v22  ;;  %v2638_v56 = vld [vmem:[#allocation2 + $0x210] sm:$0xff] }
 0x42a   : > { %1321 = vmatpush.bf16.msra.mxu1 %v2638_v56  ;;  %v2657_v56 = vld [vmem:[#allocation2 + $0x2a8] sm:$0xff] }
 0x42b   : > { %v1028_v25 = vmax.f32 %v1019_v23, 0.0  ;;  %v2648_v23 = vld [vmem:[#allocation2 + $0x260] sm:$0xff] }
 0x42c   : > { %1427 = vmatpush.bf16.msra.mxu2 %v2648_v23 }
 0x42d   : > { %v1032_v26 = vpack.c.bf16 %v1028_v25, %v1027_v24 }
 0x42e   : > { %1322 = vmatpush.bf16.msra.mxu1 %v2637_v57 }
 0x42f   : > { %1123 = vmatmul.bf16.gmra.mxu3 %v1032_v26 }
 0x430   : > { %1428 = vmatpush.bf16.msra.mxu2 %v2647_v27 }
 0x432   : > { %1323 = vmatpush.bf16.msra.mxu1 %v2636_v0  ;;  %v2655_v0 = vld [vmem:[#allocation2 + $0x298] sm:$0xff] }
 0x482   : > { %v1109_v28 = vpop.f32.mrf.mxu3 }
 0x483   : > { %v1110_v30 = vadd.f32 %v2720_v29, %v1109_v28 }
 0x485   : > { %v1129_v33 = vmax.f32 %v1110_v30, 0.0  ;;  %v2645_v30 = vld [vmem:[#allocation2 + $0x248] sm:$0xff] }
 0x48a   : > { %v1111_v31 = vpop.f32.mrf.mxu3 }
 0x48b   : > { %v1112_v32 = vadd.f32 %v2720_v29, %v1111_v31 }
 0x48d   : > { %v1130_v34 = vmax.f32 %v1112_v32, 0.0 }
 0x48f   : > { %v1137_v35 = vpack.c.bf16 %v1130_v34, %v1129_v33 }
 0x491   : > { %1216 = vmatmul.bf16.vlgmr.msra.gmra.mxu0 %v1137_v35 }
 0x492   : > { %v1114_v36 = vpop.f32.mrf.mxu3 }
 0x493   : > { %v1115_v37 = vadd.f32 %v2720_v29, %v1114_v36 }
 0x495   : > { %v1131_v40 = vmax.f32 %v1115_v37, 0.0  ;;  %v2644_v37 = vld [vmem:[#allocation2 + $0x240] sm:$0xff] }
 0x49a   : > { %v1116_v38 = vpop.f32.mrf.mxu3 }
 0x49b   : > { %v1117_v39 = vadd.f32 %v2720_v29, %v1116_v38 }
 0x49d   : > { %v1132_v41 = vmax.f32 %v1117_v39, 0.0  ;;  %v2722_v39 = vld [vmem:[%s2935_s4 + $0x8] ss:$0 sm:$0xff] }
 0x49f   : > { %v1138_v42 = vpack.c.bf16 %v1132_v41, %v1131_v40 }
 0x4a1   : > { %1221 = vmatmul.bf16.gmra.mxu0 %v1138_v42 }
 0x4a2   : > { %v1119_v44 = vpop.f32.mrf.mxu3 }
 0x4a3   : > { %v1120_v47 = vadd.f32 %v2720_v29, %v1119_v44 }
 0x4a5   : > { %v1133_v51 = vmax.f32 %v1120_v47, 0.0 }
 0x4aa   : > { %v1121_v48 = vpop.f32.mrf.mxu3 }
 0x4ab   : > { %v1122_v49 = vadd.f32 %v2720_v29, %v1121_v48 }
 0x4ad   : > { %v1134_v52 = vmax.f32 %v1122_v49, 0.0 }
 0x4af   : > { %v1139_v53 = vpack.c.bf16 %v1134_v52, %v1133_v51 }
 0x4b1   : > { %1226 = vmatmul.bf16.gmra.mxu0 %v1139_v53  ;;  %v2659_v53 = vld [vmem:[#allocation2 + $0x2b8] sm:$0xff] }
 0x4b2   : > { %v1124_v55 = vpop.f32.mrf.mxu3  ;;  %1532 = vmatpush.bf16.msra.mxu3 %v2659_v53 }
 0x4b3   : > { %v1125_v58 = vadd.f32 %v2720_v29, %v1124_v55  ;;  %v2658_v55 = vld [vmem:[#allocation2 + $0x2b0] sm:$0xff] }
 0x4b5   : > { %v1135_v61 = vmax.f32 %v1125_v58, 0.0 }
 0x4b6   : > { %1533 = vmatpush.bf16.msra.mxu3 %v2658_v55 }
 0x4ba   : > { %v1126_v59 = vpop.f32.mrf.mxu3  ;;  %1534 = vmatpush.bf16.msra.mxu3 %v2657_v56 }
 0x4bb   : > { %v1127_v60 = vadd.f32 %v2720_v29, %v1126_v59  ;;  %v2646_v29 = vld [vmem:[#allocation2 + $0x250] sm:$0xff] }
 0x4bc   : > { %1429 = vmatpush.bf16.msra.mxu2 %v2646_v29  ;;  %v2665_v29 = vld [vmem:[#allocation2 + $0x2e8] sm:$0xff] }
 0x4bd   : > { %v1136_v62 = vmax.f32 %v1127_v60, 0.0  ;;  %v2656_v60 = vld [vmem:[#allocation2 + $0x2a0] sm:$0xff] }
 0x4be   : > { %1535 = vmatpush.bf16.msra.mxu3 %v2656_v60 }
 0x4bf   : > { %v1140_v63 = vpack.c.bf16 %v1136_v62, %v1135_v61 }
 0x4c0   : > { %1430 = vmatpush.bf16.msra.mxu2 %v2645_v30 }
 0x4c1   : > { %1231 = vmatmul.bf16.gmra.mxu0 %v1140_v63 }
 0x4c2   : > { %1536 = vmatpush.bf16.msra.mxu3 %v2655_v0 }
 0x4c4   : > { %1431 = vmatpush.bf16.msra.mxu2 %v2644_v37  ;;  %v2663_v37 = vld [vmem:[#allocation2 + $0x2d8] sm:$0xff] }
 0x50e   : > { %v1217_v1 = vpop.f32.mrf.mxu0 }
 0x50f   : > { %v1218_v3 = vadd.f32 %v2721_v2, %v1217_v1 }
 0x511   : > { %v1237_v6 = vmax.f32 %v1218_v3, 0.0  ;;  %v2653_v3 = vld [vmem:[#allocation2 + $0x288] sm:$0xff] }
 0x516   : > { %v1219_v4 = vpop.f32.mrf.mxu0 }
 0x517   : > { %v1220_v5 = vadd.f32 %v2721_v2, %v1219_v4 }
 0x519   : > { %v1238_v7 = vmax.f32 %v1220_v5, 0.0 }
 0x51b   : > { %v1245_v8 = vpack.c.bf16 %v1238_v7, %v1237_v6 }
 0x51d   : > { %1324 = vmatmul.bf16.vlgmr.msra.gmra.mxu1 %v1245_v8 }
 0x51e   : > { %v1222_v9 = vpop.f32.mrf.mxu0 }
 0x51f   : > { %v1223_v10 = vadd.f32 %v2721_v2, %v1222_v9 }
 0x521   : > { %v1239_v13 = vmax.f32 %v1223_v10, 0.0  ;;  %v2652_v10 = vld [vmem:[#allocation2 + $0x280] sm:$0xff] }
 0x526   : > { %v1224_v11 = vpop.f32.mrf.mxu0 }
 0x527   : > { %v1225_v12 = vadd.f32 %v2721_v2, %v1224_v11 }
 0x529   : > { %v1240_v14 = vmax.f32 %v1225_v12, 0.0  ;;  %v2723_v12 = vld [vmem:[%s2935_s4 + $0x9] ss:$0 sm:$0xff] }
 0x52b   : > { %v1246_v15 = vpack.c.bf16 %v1240_v14, %v1239_v13 }
 0x52d   : > { %1329 = vmatmul.bf16.gmra.mxu1 %v1246_v15 }
 0x52e   : > { %v1227_v17 = vpop.f32.mrf.mxu0 }
 0x52f   : > { %v1228_v20 = vadd.f32 %v2721_v2, %v1227_v17 }
 0x531   : > { %v1241_v24 = vmax.f32 %v1228_v20, 0.0 }
 0x536   : > { %v1229_v21 = vpop.f32.mrf.mxu0 }
 0x537   : > { %v1230_v22 = vadd.f32 %v2721_v2, %v1229_v21 }
 0x539   : > { %v1242_v25 = vmax.f32 %v1230_v22, 0.0 }
 0x53b   : > { %v1247_v26 = vpack.c.bf16 %v1242_v25, %v1241_v24 }
 0x53d   : > { %1334 = vmatmul.bf16.gmra.mxu1 %v1247_v26  ;;  %v2667_v26 = vld [vmem:[#allocation2 + $0x2f8] sm:$0xff] }
 0x53e   : > { %v1232_v28 = vpop.f32.mrf.mxu0  ;;  %1640 = vmatpush.bf16.msrb.mxu0 %v2667_v26 }
 0x53f   : > { %v1233_v31 = vadd.f32 %v2721_v2, %v1232_v28  ;;  %v2666_v28 = vld [vmem:[#allocation2 + $0x2f0] sm:$0xff] }
 0x541   : > { %v1243_v34 = vmax.f32 %v1233_v31, 0.0 }
 0x542   : > { %1641 = vmatpush.bf16.msrb.mxu0 %v2666_v28 }
 0x546   : > { %v1234_v32 = vpop.f32.mrf.mxu0  ;;  %1642 = vmatpush.bf16.msrb.mxu0 %v2665_v29 }
 0x547   : > { %v1235_v33 = vadd.f32 %v2721_v2, %v1234_v32  ;;  %v2654_v2 = vld [vmem:[#allocation2 + $0x290] sm:$0xff] }
 0x548   : > { %1537 = vmatpush.bf16.msra.mxu3 %v2654_v2  ;;  %v2673_v2 = vld [vmem:[#allocation2 + $0x328] sm:$0xff] }
 0x549   : > { %v1244_v35 = vmax.f32 %v1235_v33, 0.0  ;;  %v2664_v33 = vld [vmem:[#allocation2 + $0x2e0] sm:$0xff] }
 0x54a   : > { %1643 = vmatpush.bf16.msrb.mxu0 %v2664_v33 }
 0x54b   : > { %v1248_v36 = vpack.c.bf16 %v1244_v35, %v1243_v34 }
 0x54c   : > { %1538 = vmatpush.bf16.msra.mxu3 %v2653_v3 }
 0x54d   : > { %1339 = vmatmul.bf16.gmra.mxu1 %v1248_v36 }
 0x54e   : > { %1644 = vmatpush.bf16.msrb.mxu0 %v2663_v37 }
 0x550   : > { %1539 = vmatpush.bf16.msra.mxu3 %v2652_v10  ;;  %v2671_v10 = vld [vmem:[#allocation2 + $0x318] sm:$0xff] }
 0x59a   : > { %v1325_v38 = vpop.f32.mrf.mxu1 }
 0x59b   : > { %v1326_v40 = vadd.f32 %v2722_v39, %v1325_v38 }
 0x59d   : > { %v1345_v43 = vmax.f32 %v1326_v40, 0.0  ;;  %v2661_v40 = vld [vmem:[#allocation2 + $0x2c8] sm:$0xff] }
 0x5a2   : > { %v1327_v41 = vpop.f32.mrf.mxu1 }
 0x5a3   : > { %v1328_v42 = vadd.f32 %v2722_v39, %v1327_v41 }
 0x5a5   : > { %v1346_v44 = vmax.f32 %v1328_v42, 0.0 }
 0x5a7   : > { %v1353_v45 = vpack.c.bf16 %v1346_v44, %v1345_v43 }
 0x5a9   : > { %1432 = vmatmul.bf16.vlgmr.msra.gmra.mxu2 %v1353_v45 }
 0x5aa   : > { %v1330_v46 = vpop.f32.mrf.mxu1 }
 0x5ab   : > { %v1331_v47 = vadd.f32 %v2722_v39, %v1330_v46 }
 0x5ad   : > { %v1347_v50 = vmax.f32 %v1331_v47, 0.0  ;;  %v2660_v47 = vld [vmem:[#allocation2 + $0x2c0] sm:$0xff] }
 0x5b2   : > { %v1332_v48 = vpop.f32.mrf.mxu1 }
 0x5b3   : > { %v1333_v49 = vadd.f32 %v2722_v39, %v1332_v48 }
 0x5b5   : > { %v1348_v51 = vmax.f32 %v1333_v49, 0.0  ;;  %v2724_v49 = vld [vmem:[%s2935_s4 + $0xa] ss:$0 sm:$0xff] }
 0x5b7   : > { %v1354_v52 = vpack.c.bf16 %v1348_v51, %v1347_v50 }
 0x5b9   : > { %1437 = vmatmul.bf16.gmra.mxu2 %v1354_v52 }
 0x5ba   : > { %v1335_v54 = vpop.f32.mrf.mxu1 }
 0x5bb   : > { %v1336_v57 = vadd.f32 %v2722_v39, %v1335_v54 }
 0x5bd   : > { %v1349_v61 = vmax.f32 %v1336_v57, 0.0 }
 0x5c2   : > { %v1337_v58 = vpop.f32.mrf.mxu1 }
 0x5c3   : > { %v1338_v59 = vadd.f32 %v2722_v39, %v1337_v58 }
 0x5c5   : > { %v1350_v62 = vmax.f32 %v1338_v59, 0.0 }
 0x5c7   : > { %v1355_v63 = vpack.c.bf16 %v1350_v62, %v1349_v61 }
 0x5c9   : > { %1442 = vmatmul.bf16.gmra.mxu2 %v1355_v63  ;;  %v2675_v63 = vld [vmem:[#allocation2 + $0x338] sm:$0xff] }
 0x5ca   : > { %v1340_v1 = vpop.f32.mrf.mxu1  ;;  %1748 = vmatpush.bf16.msrb.mxu1 %v2675_v63 }
 0x5cb   : > { %v1341_v4 = vadd.f32 %v2722_v39, %v1340_v1  ;;  %v2674_v1 = vld [vmem:[#allocation2 + $0x330] sm:$0xff] }
 0x5cd   : > { %v1351_v7 = vmax.f32 %v1341_v4, 0.0 }
 0x5ce   : > { %1749 = vmatpush.bf16.msrb.mxu1 %v2674_v1 }
 0x5d2   : > { %v1342_v5 = vpop.f32.mrf.mxu1  ;;  %1750 = vmatpush.bf16.msrb.mxu1 %v2673_v2 }
 0x5d3   : > { %v1343_v6 = vadd.f32 %v2722_v39, %v1342_v5  ;;  %v2662_v39 = vld [vmem:[#allocation2 + $0x2d0] sm:$0xff] }
 0x5d4   : > { %1645 = vmatpush.bf16.msrb.mxu0 %v2662_v39  ;;  %v2681_v39 = vld [vmem:[#allocation2 + $0x368] sm:$0xff] }
 0x5d5   : > { %v1352_v8 = vmax.f32 %v1343_v6, 0.0  ;;  %v2672_v6 = vld [vmem:[#allocation2 + $0x320] sm:$0xff] }
 0x5d6   : > { %1751 = vmatpush.bf16.msrb.mxu1 %v2672_v6 }
 0x5d7   : > { %v1356_v9 = vpack.c.bf16 %v1352_v8, %v1351_v7 }
 0x5d8   : > { %1646 = vmatpush.bf16.msrb.mxu0 %v2661_v40 }
 0x5d9   : > { %1447 = vmatmul.bf16.gmra.mxu2 %v1356_v9 }
 0x5da   : > { %1752 = vmatpush.bf16.msrb.mxu1 %v2671_v10 }
 0x5dc   : > { %1647 = vmatpush.bf16.msrb.mxu0 %v2660_v47  ;;  %v2679_v47 = vld [vmem:[#allocation2 + $0x358] sm:$0xff] }
 0x62c   : > { %v1433_v11 = vpop.f32.mrf.mxu2 }
 0x62d   : > { %v1434_v13 = vadd.f32 %v2723_v12, %v1433_v11 }
 0x62f   : > { %v1453_v16 = vmax.f32 %v1434_v13, 0.0  ;;  %v2669_v13 = vld [vmem:[#allocation2 + $0x308] sm:$0xff] }
 0x634   : > { %v1435_v14 = vpop.f32.mrf.mxu2 }
 0x635   : > { %v1436_v15 = vadd.f32 %v2723_v12, %v1435_v14 }
 0x637   : > { %v1454_v17 = vmax.f32 %v1436_v15, 0.0 }
 0x639   : > { %v1461_v18 = vpack.c.bf16 %v1454_v17, %v1453_v16 }
 0x63b   : > { %1540 = vmatmul.bf16.vlgmr.msra.gmra.mxu3 %v1461_v18 }
 0x63c   : > { %v1438_v19 = vpop.f32.mrf.mxu2 }
 0x63d   : > { %v1439_v20 = vadd.f32 %v2723_v12, %v1438_v19 }
 0x63f   : > { %v1455_v23 = vmax.f32 %v1439_v20, 0.0  ;;  %v2668_v20 = vld [vmem:[#allocation2 + $0x300] sm:$0xff] }
 0x644   : > { %v1440_v21 = vpop.f32.mrf.mxu2 }
 0x645   : > { %v1441_v22 = vadd.f32 %v2723_v12, %v1440_v21 }
 0x647   : > { %v1456_v24 = vmax.f32 %v1441_v22, 0.0  ;;  %v2725_v22 = vld [vmem:[%s2935_s4 + $0xb] ss:$0 sm:$0xff] }
 0x649   : > { %v1462_v25 = vpack.c.bf16 %v1456_v24, %v1455_v23 }
 0x64b   : > { %1545 = vmatmul.bf16.gmra.mxu3 %v1462_v25 }
 0x64c   : > { %v1443_v27 = vpop.f32.mrf.mxu2 }
 0x64d   : > { %v1444_v30 = vadd.f32 %v2723_v12, %v1443_v27 }
 0x64f   : > { %v1457_v34 = vmax.f32 %v1444_v30, 0.0 }
 0x654   : > { %v1445_v31 = vpop.f32.mrf.mxu2 }
 0x655   : > { %v1446_v32 = vadd.f32 %v2723_v12, %v1445_v31 }
 0x657   : > { %v1458_v35 = vmax.f32 %v1446_v32, 0.0 }
 0x659   : > { %v1463_v36 = vpack.c.bf16 %v1458_v35, %v1457_v34 }
 0x65b   : > { %1550 = vmatmul.bf16.gmra.mxu3 %v1463_v36  ;;  %v2683_v36 = vld [vmem:[#allocation2 + $0x378] sm:$0xff] }
 0x65c   : > { %v1448_v38 = vpop.f32.mrf.mxu2  ;;  %1856 = vmatpush.bf16.msrb.mxu2 %v2683_v36 }
 0x65d   : > { %v1449_v41 = vadd.f32 %v2723_v12, %v1448_v38  ;;  %v2682_v38 = vld [vmem:[#allocation2 + $0x370] sm:$0xff] }
 0x65f   : > { %v1459_v44 = vmax.f32 %v1449_v41, 0.0 }
 0x660   : > { %1857 = vmatpush.bf16.msrb.mxu2 %v2682_v38 }
 0x664   : > { %v1450_v42 = vpop.f32.mrf.mxu2  ;;  %1858 = vmatpush.bf16.msrb.mxu2 %v2681_v39 }
 0x665   : > { %v1451_v43 = vadd.f32 %v2723_v12, %v1450_v42  ;;  %v2670_v12 = vld [vmem:[#allocation2 + $0x310] sm:$0xff] }
 0x666   : > { %1753 = vmatpush.bf16.msrb.mxu1 %v2670_v12  ;;  %v2689_v12 = vld [vmem:[%s2936_s5 + $0x28] sm:$0xff] }
 0x667   : > { %v1460_v45 = vmax.f32 %v1451_v43, 0.0  ;;  %v2680_v43 = vld [vmem:[#allocation2 + $0x360] sm:$0xff] }
 0x668   : > { %1859 = vmatpush.bf16.msrb.mxu2 %v2680_v43 }
 0x669   : > { %v1464_v46 = vpack.c.bf16 %v1460_v45, %v1459_v44 }
 0x66a   : > { %1754 = vmatpush.bf16.msrb.mxu1 %v2669_v13 }
 0x66b   : > { %1555 = vmatmul.bf16.gmra.mxu3 %v1464_v46 }
 0x66c   : > { %1860 = vmatpush.bf16.msrb.mxu2 %v2679_v47 }
 0x66e   : > { %1755 = vmatpush.bf16.msrb.mxu1 %v2668_v20  ;;  %v2687_v20 = vld [vmem:[%s2936_s5 + $0x18] sm:$0xff] }
 0x6be   : > { %v1541_v48 = vpop.f32.mrf.mxu3 }
 0x6bf   : > { %v1542_v50 = vadd.f32 %v2724_v49, %v1541_v48 }
 0x6c1   : > { %v1561_v53 = vmax.f32 %v1542_v50, 0.0  ;;  %v2677_v50 = vld [vmem:[#allocation2 + $0x348] sm:$0xff] }
 0x6c6   : > { %v1543_v51 = vpop.f32.mrf.mxu3 }
 0x6c7   : > { %v1544_v52 = vadd.f32 %v2724_v49, %v1543_v51 }
 0x6c9   : > { %v1562_v54 = vmax.f32 %v1544_v52, 0.0 }
 0x6cb   : > { %v1569_v55 = vpack.c.bf16 %v1562_v54, %v1561_v53 }
 0x6cd   : > { %1648 = vmatmul.bf16.vlgmr.msrb.gmra.mxu0 %v1569_v55 }
 0x6ce   : > { %v1546_v56 = vpop.f32.mrf.mxu3 }
 0x6cf   : > { %v1547_v57 = vadd.f32 %v2724_v49, %v1546_v56 }
 0x6d1   : > { %v1563_v60 = vmax.f32 %v1547_v57, 0.0  ;;  %v2676_v57 = vld [vmem:[#allocation2 + $0x340] sm:$0xff] }
 0x6d6   : > { %v1548_v58 = vpop.f32.mrf.mxu3 }
 0x6d7   : > { %v1549_v59 = vadd.f32 %v2724_v49, %v1548_v58 }
 0x6d9   : > { %v1564_v61 = vmax.f32 %v1549_v59, 0.0  ;;  %v2726_v59 = vld [vmem:[%s2935_s4 + $0xc] ss:$0 sm:$0xff] }
 0x6db   : > { %v1570_v62 = vpack.c.bf16 %v1564_v61, %v1563_v60 }
 0x6dd   : > { %1653 = vmatmul.bf16.gmra.mxu0 %v1570_v62 }
 0x6de   : > { %v1551_v0 = vpop.f32.mrf.mxu3 }
 0x6df   : > { %v1552_v3 = vadd.f32 %v2724_v49, %v1551_v0 }
 0x6e1   : > { %v1565_v7 = vmax.f32 %v1552_v3, 0.0 }
 0x6e6   : > { %v1553_v4 = vpop.f32.mrf.mxu3 }
 0x6e7   : > { %v1554_v5 = vadd.f32 %v2724_v49, %v1553_v4 }
 0x6e9   : > { %v1566_v8 = vmax.f32 %v1554_v5, 0.0 }
 0x6eb   : > { %v1571_v9 = vpack.c.bf16 %v1566_v8, %v1565_v7 }
 0x6ed   : > { %1658 = vmatmul.bf16.gmra.mxu0 %v1571_v9  ;;  %v2691_v9 = vld [vmem:[%s2936_s5 + $0x38] sm:$0xff] }
 0x6ee   : > { %v1556_v11 = vpop.f32.mrf.mxu3  ;;  %1965 = vmatpush.bf16.msrb.mxu3 %v2691_v9 }
 0x6ef   : > { %v1557_v14 = vadd.f32 %v2724_v49, %v1556_v11  ;;  %v2690_v11 = vld [vmem:[%s2936_s5 + $0x30] sm:$0xff] }
 0x6f1   : > { %v1567_v17 = vmax.f32 %v1557_v14, 0.0 }
 0x6f2   : > { %1966 = vmatpush.bf16.msrb.mxu3 %v2690_v11 }
 0x6f6   : > { %v1558_v15 = vpop.f32.mrf.mxu3  ;;  %1967 = vmatpush.bf16.msrb.mxu3 %v2689_v12 }
 0x6f7   : > { %v1559_v16 = vadd.f32 %v2724_v49, %v1558_v15  ;;  %v2678_v49 = vld [vmem:[#allocation2 + $0x350] sm:$0xff] }
 0x6f8   : > { %1861 = vmatpush.bf16.msrb.mxu2 %v2678_v49 }
 0x6f9   : > { %v1568_v18 = vmax.f32 %v1559_v16, 0.0  ;;  %v2688_v16 = vld [vmem:[%s2936_s5 + $0x20] sm:$0xff] }
 0x6fa   : > { %1968 = vmatpush.bf16.msrb.mxu3 %v2688_v16 }
 0x6fb   : > { %v1572_v19 = vpack.c.bf16 %v1568_v18, %v1567_v17 }
 0x6fc   : > { %1862 = vmatpush.bf16.msrb.mxu2 %v2677_v50 }
 0x6fd   : > { %1663 = vmatmul.bf16.gmra.mxu0 %v1572_v19 }
 0x6fe   : > { %1969 = vmatpush.bf16.msrb.mxu3 %v2687_v20 }
 0x700   : > { %1863 = vmatpush.bf16.msrb.mxu2 %v2676_v57 }
 0x74a   : > { %v1649_v21 = vpop.f32.mrf.mxu0 }
 0x74b   : > { %v1650_v23 = vadd.f32 %v2725_v22, %v1649_v21 }
 0x74d   : > { %v1669_v26 = vmax.f32 %v1650_v23, 0.0  ;;  %v2685_v23 = vld [vmem:[%s2936_s5 + $0x8] sm:$0xff] }
 0x752   : > { %v1651_v24 = vpop.f32.mrf.mxu0 }
 0x753   : > { %v1652_v25 = vadd.f32 %v2725_v22, %v1651_v24 }
 0x755   : > { %v1670_v27 = vmax.f32 %v1652_v25, 0.0 }
 0x757   : > { %v1677_v28 = vpack.c.bf16 %v1670_v27, %v1669_v26 }
 0x759   : > { %1756 = vmatmul.bf16.vlgmr.msrb.gmra.mxu1 %v1677_v28 }
 0x75a   : > { %v1654_v29 = vpop.f32.mrf.mxu0 }
 0x75b   : > { %v1655_v30 = vadd.f32 %v2725_v22, %v1654_v29 }
 0x75d   : > { %v1671_v33 = vmax.f32 %v1655_v30, 0.0  ;;  %v2684_v30 = vld [vmem:[%s2936_s5] sm:$0xff] }
 0x762   : > { %v1656_v31 = vpop.f32.mrf.mxu0 }
 0x763   : > { %v1657_v32 = vadd.f32 %v2725_v22, %v1656_v31 }
 0x765   : > { %v1672_v34 = vmax.f32 %v1657_v32, 0.0  ;;  %v2727_v32 = vld [vmem:[%s2935_s4 + $0xd] ss:$0 sm:$0xff] }
 0x767   : > { %v1678_v35 = vpack.c.bf16 %v1672_v34, %v1671_v33 }
 0x769   : > { %1761 = vmatmul.bf16.gmra.mxu1 %v1678_v35 }
 0x76a   : > { %v1659_v37 = vpop.f32.mrf.mxu0 }
 0x76b   : > { %v1660_v40 = vadd.f32 %v2725_v22, %v1659_v37 }
 0x76d   : > { %v1673_v44 = vmax.f32 %v1660_v40, 0.0 }
 0x772   : > { %v1661_v41 = vpop.f32.mrf.mxu0 }
 0x773   : > { %v1662_v42 = vadd.f32 %v2725_v22, %v1661_v41 }
 0x775   : > { %v1674_v45 = vmax.f32 %v1662_v42, 0.0 }
 0x777   : > { %v1679_v46 = vpack.c.bf16 %v1674_v45, %v1673_v44 }
 0x779   : > { %1766 = vmatmul.bf16.gmra.mxu1 %v1679_v46 }
 0x77a   : > { %v1664_v48 = vpop.f32.mrf.mxu0 }
 0x77b   : > { %v1665_v51 = vadd.f32 %v2725_v22, %v1664_v48 }
 0x77d   : > { %v1675_v54 = vmax.f32 %v1665_v51, 0.0 }
 0x782   : > { %v1666_v52 = vpop.f32.mrf.mxu0 }
 0x783   : > { %v1667_v53 = vadd.f32 %v2725_v22, %v1666_v52  ;;  %v2686_v22 = vld [vmem:[%s2936_s5 + $0x10] sm:$0xff] }
 0x784   : > { %1970 = vmatpush.bf16.msrb.mxu3 %v2686_v22 }
 0x785   : > { %v1676_v55 = vmax.f32 %v1667_v53, 0.0 }
 0x787   : > { %v1680_v56 = vpack.c.bf16 %v1676_v55, %v1675_v54 }
 0x788   : > { %1971 = vmatpush.bf16.msrb.mxu3 %v2685_v23 }
 0x789   : > { %1771 = vmatmul.bf16.gmra.mxu1 %v1680_v56 }
 0x78c   : > { %1972 = vmatpush.bf16.msrb.mxu3 %v2684_v30 }
 0x7d6   : > { %v1757_v58 = vpop.f32.mrf.mxu1 }
 0x7d7   : > { %v1758_v60 = vadd.f32 %v2726_v59, %v1757_v58 }
 0x7d9   : > { %v1777_v63 = vmax.f32 %v1758_v60, 0.0  ;;  %v2728_v60 = vld [vmem:[%s2937_s6] ss:$0 sm:$0xff] }
 0x7de   : > { %v1759_v61 = vpop.f32.mrf.mxu1 }
 0x7df   : > { %v1760_v62 = vadd.f32 %v2726_v59, %v1759_v61 }
 0x7e1   : > { %v1778_v0 = vmax.f32 %v1760_v62, 0.0 }
 0x7e3   : > { %v1785_v1 = vpack.c.bf16 %v1778_v0, %v1777_v63 }
 0x7e5   : > { %1864 = vmatmul.bf16.vlgmr.msrb.gmra.mxu2 %v1785_v1 }
 0x7e6   : > { %v1762_v2 = vpop.f32.mrf.mxu1 }
 0x7e7   : > { %v1763_v3 = vadd.f32 %v2726_v59, %v1762_v2 }
 0x7e9   : > { %v1779_v6 = vmax.f32 %v1763_v3, 0.0 }
 0x7ee   : > { %v1764_v4 = vpop.f32.mrf.mxu1 }
 0x7ef   : > { %v1765_v5 = vadd.f32 %v2726_v59, %v1764_v4 }
 0x7f1   : > { %v1780_v7 = vmax.f32 %v1765_v5, 0.0 }
 0x7f3   : > { %v1786_v8 = vpack.c.bf16 %v1780_v7, %v1779_v6 }
 0x7f5   : > { %1869 = vmatmul.bf16.gmra.mxu2 %v1786_v8 }
 0x7f6   : > { %v1767_v10 = vpop.f32.mrf.mxu1 }
 0x7f7   : > { %v1768_v13 = vadd.f32 %v2726_v59, %v1767_v10 }
 0x7f9   : > { %v1781_v17 = vmax.f32 %v1768_v13, 0.0 }
 0x7fe   : > { %v1769_v14 = vpop.f32.mrf.mxu1 }
 0x7ff   : > { %v1770_v15 = vadd.f32 %v2726_v59, %v1769_v14 }
 0x801   : > { %v1782_v18 = vmax.f32 %v1770_v15, 0.0 }
 0x803   : > { %v1787_v19 = vpack.c.bf16 %v1782_v18, %v1781_v17 }
 0x805   : > { %1874 = vmatmul.bf16.gmra.mxu2 %v1787_v19 }
 0x806   : > { %v1772_v21 = vpop.f32.mrf.mxu1 }
 0x807   : > { %v1773_v24 = vadd.f32 %v2726_v59, %v1772_v21 }
 0x809   : > { %v1783_v27 = vmax.f32 %v1773_v24, 0.0 }
 0x80e   : > { %v1774_v25 = vpop.f32.mrf.mxu1 }
 0x80f   : > { %v1775_v26 = vadd.f32 %v2726_v59, %v1774_v25 }
 0x811   : > { %v1784_v28 = vmax.f32 %v1775_v26, 0.0 }
 0x813   : > { %v1788_v29 = vpack.c.bf16 %v1784_v28, %v1783_v27 }
 0x815   : > { %1879 = vmatmul.bf16.gmra.mxu2 %v1788_v29 }
 0x868   : > { %v1865_v31 = vpop.f32.mrf.mxu2 }
 0x869   : > { %v1866_v33 = vadd.f32 %v2727_v32, %v1865_v31 }
 0x86b   : > { %v1885_v36 = vmax.f32 %v1866_v33, 0.0 }
 0x870   : > { %v1867_v34 = vpop.f32.mrf.mxu2 }
 0x871   : > { %v1868_v35 = vadd.f32 %v2727_v32, %v1867_v34 }
 0x873   : > { %v1886_v37 = vmax.f32 %v1868_v35, 0.0 }
 0x875   : > { %v1893_v38 = vpack.c.bf16 %v1886_v37, %v1885_v36 }
 0x877   : > { %1973 = vmatmul.bf16.vlgmr.msrb.gmra.mxu3 %v1893_v38 }
 0x878   : > { %v1870_v39 = vpop.f32.mrf.mxu2 }
 0x879   : > { %v1871_v40 = vadd.f32 %v2727_v32, %v1870_v39 }
 0x87b   : > { %v1887_v43 = vmax.f32 %v1871_v40, 0.0 }
 0x880   : > { %v1872_v41 = vpop.f32.mrf.mxu2 }
 0x881   : > { %v1873_v42 = vadd.f32 %v2727_v32, %v1872_v41 }
 0x883   : > { %v1888_v44 = vmax.f32 %v1873_v42, 0.0 }
 0x885   : > { %v1894_v45 = vpack.c.bf16 %v1888_v44, %v1887_v43 }
 0x887   : > { %1978 = vmatmul.bf16.gmra.mxu3 %v1894_v45 }
 0x888   : > { %v1875_v46 = vpop.f32.mrf.mxu2 }
 0x889   : > { %v1876_v47 = vadd.f32 %v2727_v32, %v1875_v46 }
 0x88b   : > { %v1889_v50 = vmax.f32 %v1876_v47, 0.0 }
 0x890   : > { %v1877_v48 = vpop.f32.mrf.mxu2 }
 0x891   : > { %v1878_v49 = vadd.f32 %v2727_v32, %v1877_v48 }
 0x893   : > { %v1890_v51 = vmax.f32 %v1878_v49, 0.0 }
 0x895   : > { %v1895_v52 = vpack.c.bf16 %v1890_v51, %v1889_v50 }
 0x897   : > { %1983 = vmatmul.bf16.gmra.mxu3 %v1895_v52 }
 0x898   : > { %v1880_v53 = vpop.f32.mrf.mxu2 }
 0x899   : > { %v1881_v54 = vadd.f32 %v2727_v32, %v1880_v53 }
 0x89b   : > { %v1891_v57 = vmax.f32 %v1881_v54, 0.0 }
 0x8a0   : > { %v1882_v55 = vpop.f32.mrf.mxu2 }
 0x8a1   : > { %v1883_v56 = vadd.f32 %v2727_v32, %v1882_v55 }
 0x8a3   : > { %v1892_v58 = vmax.f32 %v1883_v56, 0.0 }
 0x8a5   : > { %v1896_v59 = vpack.c.bf16 %v1892_v58, %v1891_v57 }
 0x8a7   : > { %1988 = vmatmul.bf16.gmra.mxu3 %v1896_v59 }
 0x8fa   : > { %v1974_v61 = vpop.f32.mrf.mxu3 }
 0x8fb   : > { %v1975_v62 = vadd.f32 %v2728_v60, %v1974_v61 }
 0x8fd   : > { %1994 = vst.msk [vmem:[%s297_s30] sm:$0xff] %vm328_vm1, %v1975_v62 }
 0x902   : > { %v1976_v63 = vpop.f32.mrf.mxu3 }
 0x903   : > { %v1977_v0 = vadd.f32 %v2728_v60, %v1976_v63 }
 0x905   : > { %1995 = vst.msk [vmem:[%s297_s30 + $0x8] sm:$0xff] %vm328_vm1, %v1977_v0 }
 0x90a   : > { %v1979_v1 = vpop.f32.mrf.mxu3 }
 0x90b   : > { %v1980_v2 = vadd.f32 %v2728_v60, %v1979_v1 }
 0x90d   : > { %1996 = vst.msk [vmem:[%s297_s30 + $0x10] sm:$0xff] %vm328_vm1, %v1980_v2 }
 0x912   : > { %v1981_v3 = vpop.f32.mrf.mxu3 }
 0x913   : > { %v1982_v4 = vadd.f32 %v2728_v60, %v1981_v3 }
 0x915   : > { %1997 = vst.msk [vmem:[%s297_s30 + $0x18] sm:$0xff] %vm328_vm1, %v1982_v4 }
 0x91a   : > { %v1984_v5 = vpop.f32.mrf.mxu3 }
 0x91b   : > { %v1985_v6 = vadd.f32 %v2728_v60, %v1984_v5 }
 0x91d   : > { %1998 = vst.msk [vmem:[%s297_s30 + $0x20] sm:$0xff] %vm328_vm1, %v1985_v6 }
 0x922   : > { %v1986_v7 = vpop.f32.mrf.mxu3 }
 0x923   : > { %v1987_v8 = vadd.f32 %v2728_v60, %v1986_v7 }
 0x925   : > { %1999 = vst.msk [vmem:[%s297_s30 + $0x28] sm:$0xff] %vm328_vm1, %v1987_v8 }
 0x92a   : > { %v1989_v9 = vpop.f32.mrf.mxu3 }
 0x92b   : > { %v1990_v10 = vadd.f32 %v2728_v60, %v1989_v9 }
 0x92d   : > { %2000 = vst.msk [vmem:[%s297_s30 + $0x30] sm:$0xff] %vm328_vm1, %v1990_v10 }
 0x932   : > { %v1991_v11 = vpop.f32.mrf.mxu3 }
 0x933   : > { %v1992_v12 = vadd.f32 %v2728_v60, %v1991_v11 }
 0x935   : > { %2001 = vst.msk [vmem:[%s297_s30 + $0x38] sm:$0xff] %vm328_vm1, %v1992_v12 }
 0x936 PF: > { %s18_s24 = sadd.s32 1, %s2769_s24  }
 0x937   : > { %p15_p7 = scmp.ge.s32.totalorder %s18_s24, 4  }
 0x939   :  { %17 = sbr.rel (!%p15_p7) target bundleno = 1 (0x1), region = 96 }
 0x93e   :  { %2024 = vsyncpa [#allocation3], 1 }
 0x93f   :  { %2026 = vsyncpa [#allocation3 + $0x1], 1 }

</bundles_post_ra>
